<compile_context>
chip_gen: v6e
topology: v6e:2x2x1
jax: 0.10.0
libtpu: 0.0.40
codegen_flags: <defaults>
</compile_context>

<pallas_src>
import functools

import jax
import jax.numpy as jnp
from jax import lax
from jax.experimental import pallas as pl
from jax.experimental.pallas import tpu as pltpu


EMBED_DIM = 64            # embedding_dim (PyTorch default)
H1 = 128                  # first Linear out features
H2 = 64                   # second Linear out features

TB_MAX = 512              # max batch rows per grid step (raised 256 -> 512)
CHUNK = 128               # rows per gather wave in the HBM-table path
ISSUE_UNROLL = 8          # DMA-issue loop unroll factor
ONEHOT_MAX_ROWS = 2048    # row bound for the VMEM-resident (one-hot gather) path
# TODO(synk): mid-size tables (a few MiB, > ONEHOT_MAX_ROWS rows) could also be
# made VMEM-resident with dynamic-row-index gathers instead of falling back to
# the HBM DMA path; kept out to limit kernel-count / lowering surface.


def _mlp(x, w1_ref, b1_ref, w2_ref, b2_ref, w3_ref, b3_ref):
    """Shared MLP tail: Linear(2D->128)+ReLU, Linear(128->64)+ReLU, Linear(64->1).

    `x` is the lane-dense (rows, 2D) activation, so the first layer is a single
    K=2D matmul against the original (un-split) W1.  The last layer is a VPU
    multiply + lane reduction (avoids a degenerate N=1 MXU matmul).  All f32.
    """
    h1 = jnp.dot(x, w1_ref[...], preferred_element_type=jnp.float32) + b1_ref[...]
    h1 = jnp.maximum(h1, 0.0)
    h2 = jnp.dot(h1, w2_ref[...], preferred_element_type=jnp.float32) + b2_ref[...]
    h2 = jnp.maximum(h2, 0.0)
    return jnp.sum(h2 * w3_ref[...], axis=-1, keepdims=True) + b3_ref[...]


# ----------------------------------------------------------------------------
# Path 1: small tables, fully VMEM-resident, one-hot MXU gather (no DMAs).
# ----------------------------------------------------------------------------
def _ncf_small_tables_kernel(uid_ref, iid_ref,            # (TB, 1) int32, VMEM
                             u_tab_ref, i_tab_ref,        # whole tables, VMEM
                             w1_ref, b1_ref, w2_ref, b2_ref, w3_ref, b3_ref,
                             o_ref):                      # (TB, 1) f32
    tb = uid_ref.shape[0]
    nu = u_tab_ref.shape[0]
    ni = i_tab_ref.shape[0]

    # Fused embedding gather on the MXU: one-hot(ids) @ table.  Fully
    # vectorized -- no per-row DMA descriptors, no scalar gather loop.
    one_u = (uid_ref[...] == lax.broadcasted_iota(jnp.int32, (tb, nu), 1)
             ).astype(jnp.float32)
    one_i = (iid_ref[...] == lax.broadcasted_iota(jnp.int32, (tb, ni), 1)
             ).astype(jnp.float32)
    u = jnp.dot(one_u, u_tab_ref[...], preferred_element_type=jnp.float32)
    it = jnp.dot(one_i, i_tab_ref[...], preferred_element_type=jnp.float32)

    x = jnp.concatenate([u, it], axis=-1)                 # (TB, 2D) lane-dense
    o_ref[...] = _mlp(x, w1_ref, b1_ref, w2_ref, b2_ref, w3_ref,
                      b3_ref).astype(o_ref.dtype)


# ----------------------------------------------------------------------------
# Path 2: tables in HBM, fused per-row DMA gather (double-buffered chunks,
# unrolled issue loop, aggregate semaphore waits).
# ----------------------------------------------------------------------------
def _ncf_hbm_tables_kernel(uid_ref, iid_ref,              # ids in SMEM (prefetch)
                           u_tab_ref, i_tab_ref,          # HBM tables (pl.ANY)
                           w1_ref, b1_ref, w2_ref, b2_ref, w3_ref, b3_ref,
                           o_ref,                         # (TB, 1) f32
                           u_bufs, i_bufs, sem):          # (2, CHUNK, D) x2 + sems
    tb = o_ref.shape[0]
    chunk = u_bufs.shape[1]
    n_chunks = tb // chunk
    tile_base = pl.program_id(0) * tb

    def issue(c, slot):
        # Issue all row DMAs for one chunk, unrolled so SMEM id loads and
        # descriptor pushes co-issue.  Padded rows gather row 0 (harmless,
        # sliced off in the wrapper) so byte counts stay fixed per chunk.
        cbase = tile_base + c * chunk

        @pl.loop(0, chunk // ISSUE_UNROLL)
        def _(jb):
            j0 = jb * ISSUE_UNROLL
            for v in range(ISSUE_UNROLL):
                j = j0 + v
                pltpu.make_async_copy(
                    u_tab_ref.at[pl.ds(uid_ref[cbase + j], 1)],
                    u_bufs.at[slot, pl.ds(j, 1)],
                    sem.at[slot, 0]).start()
                pltpu.make_async_copy(
                    i_tab_ref.at[pl.ds(iid_ref[cbase + j], 1)],
                    i_bufs.at[slot, pl.ds(j, 1)],
                    sem.at[slot, 1]).start()

    def wait(slot):
        # ONE aggregate wait per table per chunk: DMA semaphores count bytes,
        # and the whole-buffer descriptor's byte count equals the sum of the
        # `chunk` row copies issued on that semaphore.
        pltpu.make_async_copy(u_bufs.at[slot], u_bufs.at[slot],
                              sem.at[slot, 0]).wait()
        pltpu.make_async_copy(i_bufs.at[slot], i_bufs.at[slot],
                              sem.at[slot, 1]).wait()

    issue(0, 0)                               # prime the double buffer
    for c in range(n_chunks):                 # static unroll over chunks
        slot = c % 2
        if c + 1 < n_chunks:
            issue(c + 1, 1 - slot)            # overlap next gather with this chunk
        wait(slot)
        x = jnp.concatenate([u_bufs[slot], i_bufs[slot]], axis=-1)  # (CHUNK, 2D)
        score = _mlp(x, w1_ref, b1_ref, w2_ref, b2_ref, w3_ref, b3_ref)
        o_ref[pl.ds(c * chunk, chunk), :] = score.astype(o_ref.dtype)


# ----------------------------------------------------------------------------
# Wrapper
# ----------------------------------------------------------------------------
def _round_up(x, m):
    return ((x + m - 1) // m) * m


def _choose_tile(batch):
    """Batch tile: big enough to amortize per-step overhead, but capped at
    ceil(batch/2) rounded to 128 so nt >= 2 for large batches and the
    'parallel' grid axis can shard across both v7x TensorCores."""
    tile = _round_up(max(1, -(-batch // 2)), 128)
    return max(128, min(TB_MAX, tile))


@functools.partial(jax.jit, static_argnames=("force_hbm_tables",))
def ncf_forward(user_ids, item_ids, params, force_hbm_tables=False):
    u_tab = params["user_emb"].astype(jnp.float32)        # (num_users, D)
    i_tab = params["item_emb"].astype(jnp.float32)        # (num_items, D)
    nu, d = u_tab.shape
    ni = i_tab.shape[0]

    b = user_ids.shape[0]
    tb = _choose_tile(b)
    nt = -(-b // tb)
    b_pad = nt * tb

    # Clip ids (no OOB row DMAs on bad input) and zero-pad the batch to a tile
    # multiple; padded rows gather row 0 and are sliced off at the end.
    uid = jnp.pad(jnp.clip(user_ids.astype(jnp.int32), 0, nu - 1), (0, b_pad - b))
    iid = jnp.pad(jnp.clip(item_ids.astype(jnp.int32), 0, ni - 1), (0, b_pad - b))

    w1 = params["w1"].astype(jnp.float32)                  # (2D, H1) -- un-split
    b1 = params["b1"].reshape(1, -1).astype(jnp.float32)   # (1, H1)
    w2 = params["w2"].astype(jnp.float32)                  # (H1, H2)
    b2 = params["b2"].reshape(1, -1).astype(jnp.float32)   # (1, H2)
    w3 = params["w3"].reshape(1, -1).astype(jnp.float32)   # (1, H2) row (VPU)
    b3 = params["b3"].reshape(1, 1).astype(jnp.float32)    # (1, 1)
    h1n, h2n = w1.shape[1], w2.shape[1]

    weight_specs = [
        pl.BlockSpec((2 * d, h1n), lambda *_: (0, 0)),     # W1
        pl.BlockSpec((1, h1n), lambda *_: (0, 0)),         # b1
        pl.BlockSpec((h1n, h2n), lambda *_: (0, 0)),       # W2
        pl.BlockSpec((1, h2n), lambda *_: (0, 0)),         # b2
        pl.BlockSpec((1, h2n), lambda *_: (0, 0)),         # w3 row
        pl.BlockSpec((1, 1), lambda *_: (0, 0)),           # b3
    ]
    out_spec = pl.BlockSpec((tb, 1), lambda t, *_: (t, 0))
    weights = (w1, b1, w2, b2, w3, b3)

    small_tables = (not force_hbm_tables) and max(nu, ni) <= ONEHOT_MAX_ROWS

    if small_tables:
        # Pad table rows to a multiple of 128 so the one-hot contraction dim
        # is fully (8,128)-aligned; padded rows are never selected (ids < nu).
        nu_p, ni_p = _round_up(nu, 128), _round_up(ni, 128)
        u_tab_p = jnp.pad(u_tab, ((0, nu_p - nu), (0, 0)))
        i_tab_p = jnp.pad(i_tab, ((0, ni_p - ni), (0, 0)))
        grid_spec = pltpu.PrefetchScalarGridSpec(
            num_scalar_prefetch=0,
            grid=(nt,),
            in_specs=[
                pl.BlockSpec((tb, 1), lambda t, *_: (t, 0)),   # user ids
                pl.BlockSpec((tb, 1), lambda t, *_: (t, 0)),   # item ids
                pl.BlockSpec((nu_p, d), lambda *_: (0, 0)),    # user table (VMEM)
                pl.BlockSpec((ni_p, d), lambda *_: (0, 0)),    # item table (VMEM)
                *weight_specs,
            ],
            out_specs=out_spec,
        )
        kernel = _ncf_small_tables_kernel
        args = (uid.reshape(b_pad, 1), iid.reshape(b_pad, 1),
                u_tab_p, i_tab_p, *weights)
    else:
        grid_spec = pltpu.PrefetchScalarGridSpec(
            num_scalar_prefetch=2,                             # uid, iid -> SMEM
            grid=(nt,),
            in_specs=[
                pl.BlockSpec(memory_space=pl.ANY),             # user table (HBM)
                pl.BlockSpec(memory_space=pl.ANY),             # item table (HBM)
                *weight_specs,
            ],
            out_specs=out_spec,
            scratch_shapes=[
                pltpu.VMEM((2, CHUNK, d), jnp.float32),        # user-row double buffer
                pltpu.VMEM((2, CHUNK, d), jnp.float32),        # item-row double buffer
                pltpu.SemaphoreType.DMA((2, 2)),               # [slot, user/item]
            ],
        )
        kernel = _ncf_hbm_tables_kernel
        args = (uid, iid, u_tab, i_tab, *weights)

    scores = pl.pallas_call(
        kernel,
        out_shape=jax.ShapeDtypeStruct((b_pad, 1), jnp.float32),
        grid_spec=grid_spec,
        compiler_params=pltpu.CompilerParams(
            dimension_semantics=("parallel",)),
    )(*args)
    return scores[:b]


# ----------------------------------------------------------------------------
# Params / reference
# ----------------------------------------------------------------------------
def init_params(key, num_users, num_items, embedding_dim=EMBED_DIM):
    """Deterministic synthetic parameters (shapes match the PyTorch module);
    Linear weights are stored transposed (in_features, out_features) for x @ W."""
    ks = jax.random.split(key, 8)
    d2 = embedding_dim * 2

    def uniform(k, shape, fan_in):
        bound = 1.0 / jnp.sqrt(fan_in)
        return jax.random.uniform(k, shape, jnp.float32, -bound, bound)

    return {
        "user_emb": jax.random.normal(ks[0], (num_users, embedding_dim), jnp.float32),
        "item_emb": jax.random.normal(ks[1], (num_items, embedding_dim), jnp.float32),
        "w1": uniform(ks[2], (d2, H1), d2),
        "b1": uniform(ks[3], (1, H1), d2),
        "w2": uniform(ks[4], (H1, H2), H1),
        "b2": uniform(ks[5], (1, H2), H1),
        "w3": uniform(ks[6], (H2, 1), H2),
        "b3": uniform(ks[7], (1, 1), H2),
    }


def ncf_reference(user_ids, item_ids, params):
    """Pure-JAX reference of the PyTorch forward (full-precision matmuls)."""
    hp = jax.lax.Precision.HIGHEST
    u = jnp.take(params["user_emb"], user_ids, axis=0)
    it = jnp.take(params["item_emb"], item_ids, axis=0)
    x = jnp.concatenate([u, it], axis=-1)
    h1 = jnp.maximum(jnp.dot(x, params["w1"], precision=hp) + params["b1"], 0.0)
    h2 = jnp.maximum(jnp.dot(h1, params["w2"], precision=hp) + params["b2"], 0.0)
    return jnp.dot(h2, params["w3"], precision=hp) + params["b3"]


if __name__ == "__main__":
    key = jax.random.PRNGKey(0)
    num_users, num_items = 100, 200
    batch = 8

    k_params, k_u, k_i = jax.random.split(key, 3)
    params = init_params(k_params, num_users, num_items)

    user_ids = jax.random.randint(k_u, (batch,), 0, num_users, dtype=jnp.int32)
    item_ids = jax.random.randint(k_i, (batch,), 0, num_items, dtype=jnp.int32)

    ref = ncf_reference(user_ids, item_ids, params)

    # Path 1: tables VMEM-resident, one-hot MXU gather (auto-selected: small tables).
    out = jax.block_until_ready(ncf_forward(user_ids, item_ids, params))
    assert out.shape == (batch, 1), out.shape
    assert jnp.allclose(out, ref, atol=5e-3, rtol=5e-3), (out, ref)

    # Path 2: tables in HBM, fused per-row DMA gather (double-buffered chunks,
    # unrolled issue loop, aggregate semaphore waits).
    out_hbm = jax.block_until_ready(
        ncf_forward(user_ids, item_ids, params, force_hbm_tables=True))
    assert out_hbm.shape == (batch, 1), out_hbm.shape
    assert jnp.allclose(out_hbm, ref, atol=5e-3, rtol=5e-3), (out_hbm, ref)

    print("KERNEL_OK")
</pallas_src>

<mosaic_0001>
module attributes {stable_mosaic.version = 11 : i64} {
  func.func @_ncf_small_tables_kernel(%arg0: i32, %arg1: memref<128x1xi32, #tpu.memory_space<vmem>>, %arg2: memref<128x1xi32, #tpu.memory_space<vmem>>, %arg3: memref<128x64xf32, #tpu.memory_space<vmem>>, %arg4: memref<256x64xf32, #tpu.memory_space<vmem>>, %arg5: memref<128x128xf32, #tpu.memory_space<vmem>>, %arg6: memref<1x128xf32, #tpu.memory_space<vmem>>, %arg7: memref<128x64xf32, #tpu.memory_space<vmem>>, %arg8: memref<1x64xf32, #tpu.memory_space<vmem>>, %arg9: memref<1x64xf32, #tpu.memory_space<vmem>>, %arg10: memref<1x1xf32, #tpu.memory_space<vmem>>, %arg11: memref<128x1xf32, #tpu.memory_space<vmem>>) attributes {dimension_semantics = [#tpu.dimension_semantics<parallel>], iteration_bounds = array<i64: 1>, scalar_prefetch = 0 : i64, scratch_operands = 0 : i64, tpu.core_type = #tpu.core_type<tc>, window_params = [{transform_indices = @transform_0, window_bounds = array<i64: 128, 1>}, {transform_indices = @transform_1, window_bounds = array<i64: 128, 1>}, {pipeline_mode = #tpu.pipeline_mode<synchronous>, transform_indices = @transform_2, window_bounds = array<i64: 128, 64>}, {pipeline_mode = #tpu.pipeline_mode<synchronous>, transform_indices = @transform_3, window_bounds = array<i64: 256, 64>}, {pipeline_mode = #tpu.pipeline_mode<synchronous>, transform_indices = @transform_4, window_bounds = array<i64: 128, 128>}, {pipeline_mode = #tpu.pipeline_mode<synchronous>, transform_indices = @transform_5, window_bounds = array<i64: 1, 128>}, {pipeline_mode = #tpu.pipeline_mode<synchronous>, transform_indices = @transform_6, window_bounds = array<i64: 128, 64>}, {pipeline_mode = #tpu.pipeline_mode<synchronous>, transform_indices = @transform_7, window_bounds = array<i64: 1, 64>}, {pipeline_mode = #tpu.pipeline_mode<synchronous>, transform_indices = @transform_8, window_bounds = array<i64: 1, 64>}, {pipeline_mode = #tpu.pipeline_mode<synchronous>, transform_indices = @transform_9, window_bounds = array<i64: 1, 1>}, {transform_indices = @transform_10, window_bounds = array<i64: 128, 1>}]} {
    %c0 = arith.constant 0 : index
    %c0_0 = arith.constant 0 : index
    %0 = vector.load %arg1[%c0, %c0_0] : memref<128x1xi32, #tpu.memory_space<vmem>>, vector<128x1xi32>
    %1 = tpu.iota {dimensions = array<i32: 1>} : vector<128x128xi32>
    %2 = vector.broadcast %0 : vector<128x1xi32> to vector<128x128xi32>
    %3 = arith.cmpi eq, %2, %1 : vector<128x128xi32>
    %4 = arith.extui %3 : vector<128x128xi1> to vector<128x128xi32>
    %5 = arith.sitofp %4 : vector<128x128xi32> to vector<128x128xf32>
    %c0_1 = arith.constant 0 : index
    %c0_2 = arith.constant 0 : index
    %6 = vector.load %arg2[%c0_1, %c0_2] : memref<128x1xi32, #tpu.memory_space<vmem>>, vector<128x1xi32>
    %7 = tpu.iota {dimensions = array<i32: 1>} : vector<128x256xi32>
    %8 = vector.broadcast %6 : vector<128x1xi32> to vector<128x256xi32>
    %9 = arith.cmpi eq, %8, %7 : vector<128x256xi32>
    %10 = arith.extui %9 : vector<128x256xi1> to vector<128x256xi32>
    %11 = arith.sitofp %10 : vector<128x256xi32> to vector<128x256xf32>
    %c0_3 = arith.constant 0 : index
    %c0_4 = arith.constant 0 : index
    %12 = vector.load %arg3[%c0_3, %c0_4] : memref<128x64xf32, #tpu.memory_space<vmem>>, vector<128x64xf32>
    %cst = arith.constant dense<0.000000e+00> : vector<128x64xf32>
    %13 = tpu.matmul %5, %12, %cst {dimension_numbers = #tpu.dot_dimension_numbers<[1], [0], [0], [1], [0, 0, 1, 1], [], []>} : vector<128x128xf32>, vector<128x64xf32>, vector<128x64xf32> -> vector<128x64xf32>
    %c0_5 = arith.constant 0 : index
    %c0_6 = arith.constant 0 : index
    %14 = vector.load %arg4[%c0_5, %c0_6] : memref<256x64xf32, #tpu.memory_space<vmem>>, vector<256x64xf32>
    %cst_7 = arith.constant dense<0.000000e+00> : vector<128x64xf32>
    %15 = tpu.matmul %11, %14, %cst_7 {dimension_numbers = #tpu.dot_dimension_numbers<[1], [0], [0], [1], [0, 0, 1, 1], [], []>} : vector<128x256xf32>, vector<256x64xf32>, vector<128x64xf32> -> vector<128x64xf32>
    %16 = tpu.concatenate %13, %15 in 1 : vector<128x64xf32>, vector<128x64xf32> -> vector<128x128xf32>
    %c0_8 = arith.constant 0 : index
    %c0_9 = arith.constant 0 : index
    %17 = vector.load %arg5[%c0_8, %c0_9] : memref<128x128xf32, #tpu.memory_space<vmem>>, vector<128x128xf32>
    %cst_10 = arith.constant dense<0.000000e+00> : vector<128x128xf32>
    %18 = tpu.matmul %16, %17, %cst_10 {dimension_numbers = #tpu.dot_dimension_numbers<[1], [0], [0], [1], [0, 0, 1, 1], [], []>} : vector<128x128xf32>, vector<128x128xf32>, vector<128x128xf32> -> vector<128x128xf32>
    %c0_11 = arith.constant 0 : index
    %c0_12 = arith.constant 0 : index
    %19 = vector.load %arg6[%c0_11, %c0_12] : memref<1x128xf32, #tpu.memory_space<vmem>>, vector<1x128xf32>
    %20 = vector.broadcast %19 : vector<1x128xf32> to vector<128x128xf32>
    %21 = arith.addf %18, %20 : vector<128x128xf32>
    %cst_13 = arith.constant 0.000000e+00 : f32
    %22 = vector.broadcast %cst_13 : f32 to vector<128x128xf32>
    %23 = arith.maximumf %21, %22 : vector<128x128xf32>
    %c0_14 = arith.constant 0 : index
    %c0_15 = arith.constant 0 : index
    %24 = vector.load %arg7[%c0_14, %c0_15] : memref<128x64xf32, #tpu.memory_space<vmem>>, vector<128x64xf32>
    %cst_16 = arith.constant dense<0.000000e+00> : vector<128x64xf32>
    %25 = tpu.matmul %23, %24, %cst_16 {dimension_numbers = #tpu.dot_dimension_numbers<[1], [0], [0], [1], [0, 0, 1, 1], [], []>} : vector<128x128xf32>, vector<128x64xf32>, vector<128x64xf32> -> vector<128x64xf32>
    %c0_17 = arith.constant 0 : index
    %c0_18 = arith.constant 0 : index
    %26 = vector.load %arg8[%c0_17, %c0_18] : memref<1x64xf32, #tpu.memory_space<vmem>>, vector<1x64xf32>
    %27 = vector.broadcast %26 : vector<1x64xf32> to vector<128x64xf32>
    %28 = arith.addf %25, %27 : vector<128x64xf32>
    %cst_19 = arith.constant 0.000000e+00 : f32
    %29 = vector.broadcast %cst_19 : f32 to vector<128x64xf32>
    %30 = arith.maximumf %28, %29 : vector<128x64xf32>
    %c0_20 = arith.constant 0 : index
    %c0_21 = arith.constant 0 : index
    %31 = vector.load %arg9[%c0_20, %c0_21] : memref<1x64xf32, #tpu.memory_space<vmem>>, vector<1x64xf32>
    %32 = vector.broadcast %31 : vector<1x64xf32> to vector<128x64xf32>
    %33 = arith.mulf %30, %32 : vector<128x64xf32>
    %cst_22 = arith.constant dense<0.000000e+00> : vector<128xf32>
    %34 = vector.multi_reduction <add>, %33, %cst_22 [1] : vector<128x64xf32> to vector<128xf32>
    %35 = vector.shape_cast %34 : vector<128xf32> to vector<128x1xf32>
    %c0_23 = arith.constant 0 : index
    %c0_24 = arith.constant 0 : index
    %36 = vector.load %arg10[%c0_23, %c0_24] : memref<1x1xf32, #tpu.memory_space<vmem>>, vector<1x1xf32>
    %37 = vector.broadcast %36 : vector<1x1xf32> to vector<128x1xf32>
    %38 = arith.addf %35, %37 : vector<128x1xf32>
    %c0_25 = arith.constant 0 : index
    %c0_26 = arith.constant 0 : index
    %39 = vector.load %arg11[%c0_25, %c0_26] : memref<128x1xf32, #tpu.memory_space<vmem>>, vector<128x1xf32>
    tpu.vector_store %arg11[%c0_25, %c0_26], %38 {strides = array<i32>} : memref<128x1xf32, #tpu.memory_space<vmem>>, vector<128x1xf32>,
    return
  }
  func.func @transform_0(%arg0: i32) -> (i32, i32) {
    %c0_i32 = arith.constant 0 : i32
    %c0_i32_0 = arith.constant 0 : i32
    return %arg0, %c0_i32 : i32, i32
  }
  func.func @transform_1(%arg0: i32) -> (i32, i32) {
    %c0_i32 = arith.constant 0 : i32
    %c0_i32_0 = arith.constant 0 : i32
    return %arg0, %c0_i32 : i32, i32
  }
  func.func @transform_2(%arg0: i32) -> (i32, i32) {
    %c0_i32 = arith.constant 0 : i32
    %c0_i32_0 = arith.constant 0 : i32
    %c0_i32_1 = arith.constant 0 : i32
    return %c0_i32, %c0_i32_0 : i32, i32
  }
  func.func @transform_3(%arg0: i32) -> (i32, i32) {
    %c0_i32 = arith.constant 0 : i32
    %c0_i32_0 = arith.constant 0 : i32
    %c0_i32_1 = arith.constant 0 : i32
    return %c0_i32, %c0_i32_0 : i32, i32
  }
  func.func @transform_4(%arg0: i32) -> (i32, i32) {
    %c0_i32 = arith.constant 0 : i32
    %c0_i32_0 = arith.constant 0 : i32
    %c0_i32_1 = arith.constant 0 : i32
    return %c0_i32, %c0_i32_0 : i32, i32
  }
  func.func @transform_5(%arg0: i32) -> (i32, i32) {
    %c0_i32 = arith.constant 0 : i32
    %c0_i32_0 = arith.constant 0 : i32
    %c0_i32_1 = arith.constant 0 : i32
    return %c0_i32, %c0_i32_0 : i32, i32
  }
  func.func @transform_6(%arg0: i32) -> (i32, i32) {
    %c0_i32 = arith.constant 0 : i32
    %c0_i32_0 = arith.constant 0 : i32
    %c0_i32_1 = arith.constant 0 : i32
    return %c0_i32, %c0_i32_0 : i32, i32
  }
  func.func @transform_7(%arg0: i32) -> (i32, i32) {
    %c0_i32 = arith.constant 0 : i32
    %c0_i32_0 = arith.constant 0 : i32
    %c0_i32_1 = arith.constant 0 : i32
    return %c0_i32, %c0_i32_0 : i32, i32
  }
  func.func @transform_8(%arg0: i32) -> (i32, i32) {
    %c0_i32 = arith.constant 0 : i32
    %c0_i32_0 = arith.constant 0 : i32
    %c0_i32_1 = arith.constant 0 : i32
    return %c0_i32, %c0_i32_0 : i32, i32
  }
  func.func @transform_9(%arg0: i32) -> (i32, i32) {
    %c0_i32 = arith.constant 0 : i32
    %c0_i32_0 = arith.constant 0 : i32
    %c0_i32_1 = arith.constant 0 : i32
    return %c0_i32, %c0_i32_0 : i32, i32
  }
  func.func @transform_10(%arg0: i32) -> (i32, i32) {
    %c0_i32 = arith.constant 0 : i32
    %c0_i32_0 = arith.constant 0 : i32
    return %arg0, %c0_i32 : i32, i32
  }
}

</mosaic_0001>

<bundles_post_ra>
// kernel: ncf_forward.1
= control target key start
LH: loop header
LB: loop body
LE: loop exit
PB: predicated region body
PF: predicated region fallthrough
CT: control target
= control target key end

     0   :  { %v1735_v0 = vmov 0   ;;  %s1737_s13 = smov 64   ;;  %s2394_s1 = inlined_call_operand.vmem [shape: s32[128,1], index: 1, kind: input, shape index: {}]   ;;  %s2395_s3 = inlined_call_operand.vmem [shape: f32[256,64], index: 3, kind: input, shape index: {}]   ;;  %s2396_s2 = inlined_call_operand.vmem [shape: f32[128,64], index: 2, kind: input, shape index: {}]   ;;  %s2397_s0 = inlined_call_operand.vmem [shape: s32[128,1], index: 0, kind: input, shape index: {}]   ;;  %s2398_s4 = inlined_call_operand.vmem [shape: f32[128,128], index: 4, kind: input, shape index: {}]   ;;  %s2399_s6 = inlined_call_operand.vmem [shape: f32[128,64], index: 6, kind: input, shape index: {}]   ;;  %s2400_s5 = inlined_call_operand.vmem [shape: f32[1,128], index: 5, kind: input, shape index: {}]   ;;  %s2401_s9 = inlined_call_operand.<no memory space> [shape: f32[1,1], index: 9, kind: input, shape index: {}]   ;;  %s2402_s7 = inlined_call_operand.vmem [shape: f32[1,64], index: 7, kind: input, shape index: {}]   ;;  %s2403_s8 = inlined_call_operand.vmem [shape: f32[1,64], index: 8, kind: input, shape index: {}]   ;;  %s2404_s10 = inlined_call_operand.vmem [shape: f32[128,1], index: 10, kind: output, shape index: {}]  }
   0x1   :  { %1694 = vset.pattern.permute.xlu1 %v1735_v0  ;;  %1693 = vset.pattern.permute.xlu0 %v1735_v0  ;;  %v153_v1 = vld [vmem:[%s2394_s1 + $0x10] sm:$0xff]  ;;  %v151_v2 = vld [vmem:[%s2394_s1] sm:$0xff]  ;;  %v154_v3 = vld [vmem:[%s2394_s1 + $0x18] sm:$0xff] }
   0x2   :  { %175 = vperm.xlu1 %1694, %v153_v1   ;;  %169 = vperm.xlu0 %1693, %v151_v2   ;;  %v152_v4 = vld [vmem:[%s2394_s1 + $0x8] sm:$0xff]  ;;  %v155_v6 = vld [vmem:[%s2394_s1 + $0x20] sm:$0xff]  ;;  %v158_v7 = vld [vmem:[%s2394_s1 + $0x38] sm:$0xff] }
   0x3   :  { %v156_v5 = vld [vmem:[%s2394_s1 + $0x28] sm:$0xff]  ;;  %v157_v8 = vld [vmem:[%s2394_s1 + $0x30] sm:$0xff]  ;;  %v504_v9 = vld [vmem:[%s2395_s3 + $0xf8] sm:$0xff] }
   0x4   :  { %1346 = vmatprep.subr.mxu1 %v504_v9  ;;  %v488_v10 = vld [vmem:[%s2395_s3 + $0x78] sm:$0xff]  ;;  %v503_v11 = vld [vmem:[%s2395_s3 + $0xf0] sm:$0xff]  ;;  %v502_v13 = vld [vmem:[%s2395_s3 + $0xe8] sm:$0xff] }
   0x5   :  { %1347 = vmatpush3.msra.mxu1 %v488_v10  ;;  %v487_v12 = vld [vmem:[%s2395_s3 + $0x70] sm:$0xff]  ;;  %v160_v14 = vld [vmem:[%s2394_s1 + $0x48] sm:$0xff]  ;;  %v159_v15 = vld [vmem:[%s2394_s1 + $0x40] sm:$0xff] }
   0x6   :  { %178 = vperm.xlu1 %1694, %v154_v3   ;;  %172 = vperm.xlu0 %1693, %v152_v4   ;;  %v486_v16 = vld [vmem:[%s2395_s3 + $0x68] sm:$0xff]  ;;  %v501_v17 = vld [vmem:[%s2395_s3 + $0xe0] sm:$0xff]  ;;  %v162_v19 = vld [vmem:[%s2394_s1 + $0x58] sm:$0xff] }
   0x7   :  { %1348 = vmatprep.subr.mxu1 %v503_v11  ;;  %v485_v18 = vld [vmem:[%s2395_s3 + $0x60] sm:$0xff]  ;;  %v161_v20 = vld [vmem:[%s2394_s1 + $0x50] sm:$0xff]  ;;  %v500_v21 = vld [vmem:[%s2395_s3 + $0xd8] sm:$0xff] }
   0x8   :  { %1349 = vmatpush3.msra.mxu1 %v487_v12  ;;  %v484_v22 = vld [vmem:[%s2395_s3 + $0x58] sm:$0xff]  ;;  %v499_v23 = vld [vmem:[%s2395_s3 + $0xd0] sm:$0xff]  ;;  %v164_v26 = vld [vmem:[%s2394_s1 + $0x68] sm:$0xff] }
   0x9   :  { %1350 = vmatprep.subr.mxu1 %v502_v13  ;;  %v327_v24 = vld [vmem:[%s2396_s2 + $0x78] sm:$0xff]  ;;  %v326_v25 = vld [vmem:[%s2396_s2 + $0x70] sm:$0xff]  ;;  %v163_v27 = vld [vmem:[%s2394_s1 + $0x60] sm:$0xff] }
   0xa   :  { %184 = vperm.xlu1 %1694, %v156_v5   ;;  %181 = vperm.xlu0 %1693, %v155_v6   ;;  %v483_v28 = vld [vmem:[%s2395_s3 + $0x50] sm:$0xff]  ;;  %v498_v29 = vld [vmem:[%s2395_s3 + $0xc8] sm:$0xff]  ;;  %v166_v32 = vld [vmem:[%s2394_s1 + $0x78] sm:$0xff] }
   0xb   :  { %1351 = vmatpush3.msra.mxu1 %v486_v16  ;;  %1490 = vmatprep.subr.mxu0 %v327_v24  ;;  %v325_v30 = vld [vmem:[%s2396_s2 + $0x68] sm:$0xff]  ;;  %v165_v33 = vld [vmem:[%s2394_s1 + $0x70] sm:$0xff]  ;;  %v497_v34 = vld [vmem:[%s2395_s3 + $0xc0] sm:$0xff] }
   0xc   :  { %1352 = vmatprep.subr.mxu1 %v501_v17  ;;  %1491 = vmatpush3.msra.mxu0 %v327_v24  ;;  %v482_v31 = vld [vmem:[%s2395_s3 + $0x48] sm:$0xff]  ;;  %v324_v35 = vld [vmem:[%s2396_s2 + $0x60] sm:$0xff]  ;;  %v496_v37 = vld [vmem:[%s2395_s3 + $0xb8] sm:$0xff]  ;;  %v53_v17 = vlaneseq }
   0xd   :  { %1353 = vmatpush3.msra.mxu1 %v485_v18  ;;  %1492 = vmatprep.subr.mxu0 %v326_v25  ;;  %v481_v36 = vld [vmem:[%s2395_s3 + $0x40] sm:$0xff]  ;;  %v323_v38 = vld [vmem:[%s2396_s2 + $0x58] sm:$0xff]  ;;  %v38_v39 = vld [vmem:[%s2397_s0 + $0x8] sm:$0xff] }
   0xe   :  { %190 = vperm.xlu1 %1694, %v158_v7   ;;  %187 = vperm.xlu0 %1693, %v157_v8   ;;  %v37_v40 = vld [vmem:[%s2397_s0] sm:$0xff]  ;;  %v480_v41 = vld [vmem:[%s2395_s3 + $0x38] sm:$0xff]  ;;  %v495_v42 = vld [vmem:[%s2395_s3 + $0xb0] sm:$0xff]  ;;  %v2033_v18 = vand.u32 127, %v53_v17 }
   0xf   :  { %1354 = vmatprep.subr.mxu1 %v500_v21  ;;  %1493 = vmatpush3.msra.mxu0 %v326_v25  ;;  %v322_v43 = vld [vmem:[%s2396_s2 + $0x50] sm:$0xff]  ;;  %v40_v45 = vld [vmem:[%s2397_s0 + $0x18] sm:$0xff]  ;;  %v494_v47 = vld [vmem:[%s2395_s3 + $0xa8] sm:$0xff] }
  0x10   :  { %1355 = vmatpush3.msra.mxu1 %v484_v22  ;;  %1494 = vmatprep.subr.mxu0 %v325_v30  ;;  %v479_v44 = vld [vmem:[%s2395_s3 + $0x30] sm:$0xff]  ;;  %v321_v48 = vld [vmem:[%s2396_s2 + $0x48] sm:$0xff]  ;;  %v493_v50 = vld [vmem:[%s2395_s3 + $0xa0] sm:$0xff]  ;;  %v1736_v22 = vmov 1.0  }
  0x11   :  { %1356 = vmatprep.subr.mxu1 %v499_v23  ;;  %1495 = vmatpush3.msra.mxu0 %v325_v30  ;;  %v39_v46 = vld [vmem:[%s2397_s0 + $0x10] sm:$0xff]  ;;  %v478_v49 = vld [vmem:[%s2395_s3 + $0x28] sm:$0xff]  ;;  %v320_v51 = vld [vmem:[%s2396_s2 + $0x40] sm:$0xff] }
  0x12   :  { %196 = vperm.xlu1 %1694, %v160_v14   ;;  %193 = vperm.xlu0 %1693, %v159_v15   ;;  %v42_v52 = vld [vmem:[%s2397_s0 + $0x28] sm:$0xff]  ;;  %v41_v53 = vld [vmem:[%s2397_s0 + $0x20] sm:$0xff]  ;;  %v492_v55 = vld [vmem:[%s2395_s3 + $0x98] sm:$0xff] }
  0x13   :  { %1357 = vmatpush3.msra.mxu1 %v483_v28  ;;  %1496 = vmatprep.subr.mxu0 %v324_v35  ;;  %v477_v54 = vld [vmem:[%s2395_s3 + $0x20] sm:$0xff]  ;;  %v319_v56 = vld [vmem:[%s2396_s2 + $0x38] sm:$0xff]  ;;  %v43_v59 = vld [vmem:[%s2397_s0 + $0x30] sm:$0xff] }
  0x14   :  { %1358 = vmatprep.subr.mxu1 %v498_v29  ;;  %1497 = vmatpush3.msra.mxu0 %v324_v35  ;;  %v476_v57 = vld [vmem:[%s2395_s3 + $0x18] sm:$0xff]  ;;  %v491_v60 = vld [vmem:[%s2395_s3 + $0x90] sm:$0xff]  ;;  %v490_v63 = vld [vmem:[%s2395_s3 + $0x88] sm:$0xff] }
  0x15   :  { %1359 = vmatpush3.msra.mxu1 %v482_v31  ;;  %1498 = vmatprep.subr.mxu0 %v323_v38  ;;  %v44_v58 = vld [vmem:[%s2397_s0 + $0x38] sm:$0xff]  ;;  %v318_v61 = vld [vmem:[%s2396_s2 + $0x30] sm:$0xff]  ;;  %v317_v0 = vld [vmem:[%s2396_s2 + $0x28] sm:$0xff] }
  0x16   :  { %202 = vperm.xlu1 %1694, %v162_v19   ;;  %199 = vperm.xlu0 %1693, %v161_v20   ;;  %v475_v62 = vld [vmem:[%s2395_s3 + $0x10] sm:$0xff]  ;;  %v46_v1 = vld [vmem:[%s2397_s0 + $0x48] sm:$0xff]  ;;  %v45_v2 = vld [vmem:[%s2397_s0 + $0x40] sm:$0xff]  ;;  %v2036_v19 = vadd.s32 128, %v2033_v18 }
  0x17   :  { %1360 = vmatprep.subr.mxu1 %v497_v34  ;;  %1499 = vmatpush3.msra.mxu0 %v323_v38  ;;  %v474_v3 = vld [vmem:[%s2395_s3 + $0x8] sm:$0xff]  ;;  %v489_v4 = vld [vmem:[%s2395_s3 + $0x80] sm:$0xff]  ;;  %v48_v7 = vld [vmem:[%s2397_s0 + $0x58] sm:$0xff] }
  0x18   :  { %1361 = vmatpush3.msra.mxu1 %v481_v36  ;;  %1500 = vmatprep.subr.mxu0 %v322_v43  ;;  %v316_v5 = vld [vmem:[%s2396_s2 + $0x20] sm:$0xff]  ;;  %v47_v8 = vld [vmem:[%s2397_s0 + $0x50] sm:$0xff]  ;;  %v315_v9 = vld [vmem:[%s2396_s2 + $0x18] sm:$0xff] }
  0x19   :  { %1362 = vmatprep.subr.mxu1 %v496_v37  ;;  %1501 = vmatpush3.msra.mxu0 %v322_v43  ;;  %v473_v6 = vld [vmem:[%s2395_s3] sm:$0xff]  ;;  %v314_v10 = vld [vmem:[%s2396_s2 + $0x10] sm:$0xff]  ;;  %v50_v11 = vld [vmem:[%s2397_s0 + $0x68] sm:$0xff] }
  0x1a   :  { %208 = vperm.xlu1 %1694, %v164_v26   ;;  %205 = vperm.xlu0 %1693, %v163_v27   ;;  %v49_v12 = vld [vmem:[%s2397_s0 + $0x60] sm:$0xff]  ;;  %v313_v13 = vld [vmem:[%s2396_s2 + $0x8] sm:$0xff]  ;;  %v52_v14 = vld [vmem:[%s2397_s0 + $0x78] sm:$0xff] }
  0x1b   :  { %1363 = vmatpush3.msra.mxu1 %v480_v41  ;;  %1502 = vmatprep.subr.mxu0 %v321_v48  ;;  %v51_v15 = vld [vmem:[%s2397_s0 + $0x70] sm:$0xff]  ;;  %v312_v16 = vld [vmem:[%s2396_s2] sm:$0xff] }
  0x1c   :  { %1364 = vmatprep.subr.mxu1 %v495_v42  ;;  %1503 = vmatpush3.msra.mxu0 %v321_v48 }
  0x1d   :  { %1365 = vmatpush3.msra.mxu1 %v479_v44  ;;  %1504 = vmatprep.subr.mxu0 %v320_v51 }
  0x1e   :  { %214 = vperm.xlu1 %1694, %v166_v32   ;;  %211 = vperm.xlu0 %1693, %v165_v33  }
  0x1f   :  { %1366 = vmatprep.subr.mxu1 %v494_v47  ;;  %1505 = vmatpush3.msra.mxu0 %v320_v51 }
  0x20   :  { %1367 = vmatpush3.msra.mxu1 %v478_v49  ;;  %1506 = vmatprep.subr.mxu0 %v319_v56 }
  0x21   :  { %1368 = vmatprep.subr.mxu1 %v493_v50  ;;  %1507 = vmatpush3.msra.mxu0 %v319_v56  ;;  %v743_v56 = vld [vmem:[%s2398_s4 + $0x60] sm:$0xff] }
  0x22   :  { %59 = vperm.xlu1 %1694, %v38_v39   ;;  %56 = vperm.xlu0 %1693, %v37_v40  }
  0x23   :  { %1369 = vmatpush3.msra.mxu1 %v477_v54  ;;  %1508 = vmatprep.subr.mxu0 %v318_v61  ;;  %v745_v54 = vld [vmem:[%s2398_s4 + $0x70] sm:$0xff] }
  0x24   :  { %1370 = vmatprep.subr.mxu1 %v492_v55  ;;  %1509 = vmatpush3.msra.mxu0 %v318_v61  ;;  %v744_v55 = vld [vmem:[%s2398_s4 + $0x68] sm:$0xff]  ;;  %v738_v61 = vld [vmem:[%s2398_s4 + $0x38] sm:$0xff] }
  0x25   :  { %1371 = vmatpush3.msra.mxu1 %v476_v57  ;;  %1510 = vmatprep.subr.mxu0 %v317_v0  ;;  %v742_v57 = vld [vmem:[%s2398_s4 + $0x58] sm:$0xff] }
  0x26   :  { %65 = vperm.xlu1 %1694, %v40_v45   ;;  %62 = vperm.xlu0 %1693, %v39_v46  }
  0x27   :  { %1372 = vmatprep.subr.mxu1 %v491_v60  ;;  %1511 = vmatpush3.msra.mxu0 %v317_v0  ;;  %v739_v60 = vld [vmem:[%s2398_s4 + $0x40] sm:$0xff] }
  0x28   :  { %1373 = vmatpush3.msra.mxu1 %v475_v62  ;;  %1512 = vmatprep.subr.mxu0 %v316_v5  ;;  %v737_v62 = vld [vmem:[%s2398_s4 + $0x30] sm:$0xff]  ;;  %v735_v0 = vld [vmem:[%s2398_s4 + $0x20] sm:$0xff] }
  0x29   :  { %1374 = vmatprep.subr.mxu1 %v490_v63  ;;  %1513 = vmatpush3.msra.mxu0 %v316_v5  ;;  %v736_v63 = vld [vmem:[%s2398_s4 + $0x28] sm:$0xff] }
  0x2a   :  { %71 = vperm.xlu1 %1694, %v42_v52   ;;  %68 = vperm.xlu0 %1693, %v41_v53   ;;  %v746_v53 = vld [vmem:[%s2398_s4 + $0x78] sm:$0xff] }
  0x2b   :  { %1375 = vmatpush3.msra.mxu1 %v474_v3  ;;  %1514 = vmatprep.subr.mxu0 %v315_v9  ;;  %v732_v3 = vld [vmem:[%s2398_s4 + $0x8] sm:$0xff] }
  0x2c   :  { %1376 = vmatprep.subr.mxu1 %v489_v4  ;;  %1515 = vmatpush3.msra.mxu0 %v315_v9  ;;  %v731_v4 = vld [vmem:[%s2398_s4] sm:$0xff] }
  0x2d   :  { %1377 = vmatpush3.msra.mxu1 %v473_v6  ;;  %1516 = vmatprep.subr.mxu0 %v314_v10 }
  0x2e   :  { %77 = vperm.xlu1 %1694, %v44_v58   ;;  %74 = vperm.xlu0 %1693, %v43_v59   ;;  %v741_v58 = vld [vmem:[%s2398_s4 + $0x50] sm:$0xff]  ;;  %v740_v59 = vld [vmem:[%s2398_s4 + $0x48] sm:$0xff] }
  0x2f   :  { %1517 = vmatpush3.msra.mxu0 %v314_v10 }
  0x30   :  { %1518 = vmatprep.subr.mxu0 %v313_v13 }
  0x31   :  { %1519 = vmatpush3.msra.mxu0 %v313_v13 }
  0x32   :  { %83 = vperm.xlu1 %1694, %v46_v1   ;;  %80 = vperm.xlu0 %1693, %v45_v2   ;;  %v734_v1 = vld [vmem:[%s2398_s4 + $0x18] sm:$0xff]  ;;  %v733_v2 = vld [vmem:[%s2398_s4 + $0x10] sm:$0xff] }
  0x33   :  { %1520 = vmatprep.subr.mxu0 %v312_v16 }
  0x34   :  { %1521 = vmatpush3.msra.mxu0 %v312_v16 }
  0x35   :  { %1546 = vmatprep.subr.mxu0 %v746_v53 }
  0x36   :  { %89 = vperm.xlu1 %1694, %v48_v7   ;;  %86 = vperm.xlu0 %1693, %v47_v8  }
  0x3a   :  { %95 = vperm.xlu1 %1694, %v50_v11   ;;  %92 = vperm.xlu0 %1693, %v49_v12  }
  0x3e   :  { %101 = vperm.xlu1 %1694, %v52_v14   ;;  %98 = vperm.xlu0 %1693, %v51_v15  }
  0x7d   :  { %v176_v20 = vpop.permute.xlu1 %175  ;;  %v170_v21 = vpop.permute.xlu0 %169 }
  0x7e   :  { %vm216_vm0 = vcmp.eq.s32.totalorder %v170_v21, %v2033_v18  ;;  %vm217_vm1 = vcmp.eq.s32.totalorder %v170_v21, %v2036_v19  ;;  %vm221_vm2 = vcmp.eq.s32.totalorder %v176_v20, %v2036_v19  ;;  %vm220_vm5 = vcmp.eq.s32.totalorder %v176_v20, %v2033_v18 }
  0x7f   :  { %1278 = vmatprep.mubr.msk.f32.mxu1 %vm217_vm1, %v1736_v22 }
  0x80   :  { %1279 = vmatmul.mubr.msk.f32.vlgmr.msra.gmra.mxu1 %vm216_vm0, %v1736_v22 }
  0x81   :  { %v179_v23 = vpop.permute.xlu1 %178  ;;  %v173_v24 = vpop.permute.xlu0 %172 }
  0x82   :  { %vm218_vm3 = vcmp.eq.s32.totalorder %v173_v24, %v2033_v18  ;;  %vm219_vm4 = vcmp.eq.s32.totalorder %v173_v24, %v2036_v19  ;;  %vm223_vm6 = vcmp.eq.s32.totalorder %v179_v23, %v2036_v19  ;;  %vm222_vm7 = vcmp.eq.s32.totalorder %v179_v23, %v2033_v18 }
  0x83   :  { %1280 = vmatprep.mubr.msk.f32.mxu1 %vm219_vm4, %v1736_v22 }
  0x84   :  { %1281 = vmatmul.mubr.msk.f32.gmra.mxu1 %vm218_vm3, %v1736_v22 }
  0x85   :  { %v185_v25 = vpop.permute.xlu1 %184  ;;  %v182_v26 = vpop.permute.xlu0 %181  ;;  %1282 = vmatprep.mubr.msk.f32.mxu1 %vm221_vm2, %v1736_v22 }
  0x86   :  { %vm225_vm8 = vcmp.eq.s32.totalorder %v182_v26, %v2036_v19  ;;  %vm224_vm9 = vcmp.eq.s32.totalorder %v182_v26, %v2033_v18  ;;  %vm227_vm10 = vcmp.eq.s32.totalorder %v185_v25, %v2036_v19  ;;  %vm226_vm11 = vcmp.eq.s32.totalorder %v185_v25, %v2033_v18 }
  0x88   :  { %1283 = vmatmul.mubr.msk.f32.gmra.mxu1 %vm220_vm5, %v1736_v22 }
  0x89   :  { %v191_v27 = vpop.permute.xlu1 %190  ;;  %1284 = vmatprep.mubr.msk.f32.mxu1 %vm223_vm6, %v1736_v22  ;;  %v188_v28 = vpop.permute.xlu0 %187 }
  0x8a   :  { %vm229_vm12 = vcmp.eq.s32.totalorder %v188_v28, %v2036_v19  ;;  %vm228_vm13 = vcmp.eq.s32.totalorder %v188_v28, %v2033_v18  ;;  %vm231_vm14 = vcmp.eq.s32.totalorder %v191_v27, %v2036_v19  ;;  %vm230_vm15 = vcmp.eq.s32.totalorder %v191_v27, %v2033_v18 }
  0x8c   :  { %1285 = vmatmul.mubr.msk.f32.gmra.mxu1 %vm222_vm7, %v1736_v22 }
  0x8d   :  { %v197_v29 = vpop.permute.xlu1 %196  ;;  %1286 = vmatprep.mubr.msk.f32.mxu1 %vm225_vm8, %v1736_v22  ;;  %v194_v30 = vpop.permute.xlu0 %193 }
  0x8e   :  { %vm233_vm0 = vcmp.eq.s32.totalorder %v194_v30, %v2036_v19  ;;  %vm232_vm3 = vcmp.eq.s32.totalorder %v194_v30, %v2033_v18  ;;  %vm235_vm4 = vcmp.eq.s32.totalorder %v197_v29, %v2036_v19  ;;  %vm234_vm7 = vcmp.eq.s32.totalorder %v197_v29, %v2033_v18 }
  0x90   :  { %1287 = vmatmul.mubr.msk.f32.gmra.mxu1 %vm224_vm9, %v1736_v22 }
  0x91   :  { %v203_v31 = vpop.permute.xlu1 %202  ;;  %1288 = vmatprep.mubr.msk.f32.mxu1 %vm227_vm10, %v1736_v22  ;;  %v200_v32 = vpop.permute.xlu0 %199 }
  0x92   :  { %vm237_vm8 = vcmp.eq.s32.totalorder %v200_v32, %v2036_v19 }
  0x94   :  { %1289 = vmatmul.mubr.msk.f32.gmra.mxu1 %vm226_vm11, %v1736_v22  ;;  %vm236_vm11 = vcmp.eq.s32.totalorder %v200_v32, %v2033_v18 }
  0x95   :  { %v2063_v33 = vpop.permute.xlu1 %208  ;;  %1290 = vmatprep.mubr.msk.f32.mxu1 %vm229_vm12, %v1736_v22  ;;  %v206_v34 = vpop.permute.xlu0 %205  ;;  %vm239_vm12 = vcmp.eq.s32.totalorder %v203_v31, %v2036_v19 }
  0x98   :  { %1291 = vmatmul.mubr.msk.f32.gmra.mxu1 %vm228_vm13, %v1736_v22 }
  0x99   :  { %v2069_v35 = vpop.permute.xlu1 %214  ;;  %1292 = vmatprep.mubr.msk.f32.mxu1 %vm231_vm14, %v1736_v22  ;;  %v2072_v36 = vpop.permute.xlu0 %211 }
  0x9c   :  { %1293 = vmatmul.mubr.msk.f32.gmra.mxu1 %vm230_vm15, %v1736_v22  ;;  %vm238_vm15 = vcmp.eq.s32.totalorder %v203_v31, %v2033_v18 }
  0x9d   :  { %1294 = vmatprep.mubr.msk.f32.mxu1 %vm233_vm0, %v1736_v22  ;;  %v60_v37 = vpop.permute.xlu1 %59  ;;  %v57_v38 = vpop.permute.xlu0 %56  ;;  %vm241_vm0 = vcmp.eq.s32.totalorder %v206_v34, %v2036_v19 }
  0x9e   :  { %vm104_vm1 = vcmp.eq.s32.totalorder %v60_v37, %v2033_v18  ;;  %vm103_vm2 = vcmp.eq.s32.totalorder %v57_v38, %v2033_v18 }
  0x9f   :  { %1522 = vmatprep.mubr.msk.f32.mxu0 %vm103_vm2, %v1736_v22 }
  0xa0   :  { %1523 = vmatmul.mubr.msk.f32.vlgmr.msra.gmra.mxu0 %vm104_vm1, %v1736_v22  ;;  %1295 = vmatmul.mubr.msk.f32.gmra.mxu1 %vm232_vm3, %v1736_v22  ;;  %vm240_vm3 = vcmp.eq.s32.totalorder %v206_v34, %v2033_v18 }
  0xa1   :  { %1296 = vmatprep.mubr.msk.f32.mxu1 %vm235_vm4, %v1736_v22  ;;  %v66_v39 = vpop.permute.xlu1 %65  ;;  %v63_v40 = vpop.permute.xlu0 %62  ;;  %vm243_vm4 = vcmp.eq.s32.totalorder %v2063_v33, %v2036_v19  ;;  %1547 = vmatpush3.msra.mxu0 %v746_v53 }
  0xa2   :  { %vm106_vm5 = vcmp.eq.s32.totalorder %v66_v39, %v2033_v18  ;;  %vm105_vm6 = vcmp.eq.s32.totalorder %v63_v40, %v2033_v18  ;;  %1548 = vmatprep.subr.mxu0 %v745_v54 }
  0xa3   :  { %1525 = vmatprep.mubr.msk.f32.mxu0 %vm105_vm6, %v1736_v22  ;;  %1549 = vmatpush3.msra.mxu0 %v745_v54 }
  0xa4   :  { %1526 = vmatmul.mubr.msk.f32.gmra.mxu0 %vm106_vm5, %v1736_v22  ;;  %1297 = vmatmul.mubr.msk.f32.gmra.mxu1 %vm234_vm7, %v1736_v22  ;;  %vm242_vm7 = vcmp.eq.s32.totalorder %v2063_v33, %v2033_v18 }
  0xa5   :  { %1298 = vmatprep.mubr.msk.f32.mxu1 %vm237_vm8, %v1736_v22  ;;  %v72_v41 = vpop.permute.xlu1 %71  ;;  %v69_v42 = vpop.permute.xlu0 %68  ;;  %vm245_vm8 = vcmp.eq.s32.totalorder %v2072_v36, %v2036_v19  ;;  %1550 = vmatprep.subr.mxu0 %v744_v55 }
  0xa6   :  { %vm108_vm9 = vcmp.eq.s32.totalorder %v72_v41, %v2033_v18  ;;  %vm107_vm10 = vcmp.eq.s32.totalorder %v69_v42, %v2033_v18  ;;  %1551 = vmatpush3.msra.mxu0 %v744_v55 }
  0xa7   :  { %1528 = vmatprep.mubr.msk.f32.mxu0 %vm107_vm10, %v1736_v22  ;;  %1552 = vmatprep.subr.mxu0 %v743_v56 }
  0xa8   :  { %1529 = vmatmul.mubr.msk.f32.gmra.mxu0 %vm108_vm9, %v1736_v22  ;;  %1299 = vmatmul.mubr.msk.f32.gmra.mxu1 %vm236_vm11, %v1736_v22  ;;  %vm244_vm11 = vcmp.eq.s32.totalorder %v2072_v36, %v2033_v18 }
  0xa9   :  { %1300 = vmatprep.mubr.msk.f32.mxu1 %vm239_vm12, %v1736_v22  ;;  %v78_v43 = vpop.permute.xlu1 %77  ;;  %v75_v44 = vpop.permute.xlu0 %74  ;;  %vm247_vm12 = vcmp.eq.s32.totalorder %v2069_v35, %v2036_v19  ;;  %1553 = vmatpush3.msra.mxu0 %v743_v56  ;;  %v930_v56 = vld [vmem:[%s2399_s6 + $0x78] sm:$0xff] }
  0xaa   :  { %vm110_vm13 = vcmp.eq.s32.totalorder %v78_v43, %v2033_v18  ;;  %vm109_vm14 = vcmp.eq.s32.totalorder %v75_v44, %v2033_v18  ;;  %1554 = vmatprep.subr.mxu0 %v742_v57  ;;  %1658 = vmatprep.subr.mxu1 %v930_v56 }
  0xab   :  { %1531 = vmatprep.mubr.msk.f32.mxu0 %vm109_vm14, %v1736_v22  ;;  %1555 = vmatpush3.msra.mxu0 %v742_v57 }
  0xac   :  { %1532 = vmatmul.mubr.msk.f32.gmra.mxu0 %vm110_vm13, %v1736_v22  ;;  %1301 = vmatmul.mubr.msk.f32.gmra.mxu1 %vm238_vm15, %v1736_v22  ;;  %vm246_vm15 = vcmp.eq.s32.totalorder %v2069_v35, %v2033_v18 }
  0xad   :  { %1302 = vmatprep.mubr.msk.f32.mxu1 %vm241_vm0, %v1736_v22  ;;  %v84_v45 = vpop.permute.xlu1 %83  ;;  %v81_v46 = vpop.permute.xlu0 %80  ;;  %1556 = vmatprep.subr.mxu0 %v741_v58  ;;  %vm714_vm0 = vcmask 523264  }
  0xae   :  { %vm112_vm1 = vcmp.eq.s32.totalorder %v84_v45, %v2033_v18  ;;  %vm111_vm2 = vcmp.eq.s32.totalorder %v81_v46, %v2033_v18  ;;  %1557 = vmatpush3.msra.mxu0 %v741_v58  ;;  %v929_v58 = vld [vmem:[%s2399_s6 + $0x70] sm:$0xff]  ;;  %1674 = vmatpush3.msra.mxu1 %v930_v56 }
  0xaf   :  { %1534 = vmatprep.mubr.msk.f32.mxu0 %vm111_vm2, %v1736_v22  ;;  %1558 = vmatprep.subr.mxu0 %v740_v59 }
  0xb0   :  { %1535 = vmatmul.mubr.msk.f32.gmra.mxu0 %vm112_vm1, %v1736_v22  ;;  %1303 = vmatmul.mubr.msk.f32.gmra.mxu1 %vm240_vm3, %v1736_v22  ;;  %vm1193_vm1 = vcmask 7168  }
  0xb1   :  { %1304 = vmatprep.mubr.msk.f32.mxu1 %vm243_vm4, %v1736_v22  ;;  %v90_v47 = vpop.permute.xlu1 %89  ;;  %v87_v48 = vpop.permute.xlu0 %86  ;;  %1559 = vmatpush3.msra.mxu0 %v740_v59 }
  0xb2   :  { %vm114_vm5 = vcmp.eq.s32.totalorder %v90_v47, %v2033_v18  ;;  %vm113_vm6 = vcmp.eq.s32.totalorder %v87_v48, %v2033_v18  ;;  %1560 = vmatprep.subr.mxu0 %v739_v60  ;;  %1659 = vmatprep.subr.mxu1 %v929_v58 }
  0xb3   :  { %1537 = vmatprep.mubr.msk.f32.mxu0 %vm113_vm6, %v1736_v22  ;;  %1561 = vmatpush3.msra.mxu0 %v739_v60 }
  0xb4   :  { %1538 = vmatmul.mubr.msk.f32.gmra.mxu0 %vm114_vm5, %v1736_v22  ;;  %1305 = vmatmul.mubr.msk.f32.gmra.mxu1 %vm242_vm7, %v1736_v22 }
  0xb5   :  { %1306 = vmatprep.mubr.msk.f32.mxu1 %vm245_vm8, %v1736_v22  ;;  %v96_v49 = vpop.permute.xlu1 %95  ;;  %v93_v50 = vpop.permute.xlu0 %92  ;;  %1562 = vmatprep.subr.mxu0 %v738_v61 }
  0xb6   :  { %vm116_vm9 = vcmp.eq.s32.totalorder %v96_v49, %v2033_v18  ;;  %vm115_vm10 = vcmp.eq.s32.totalorder %v93_v50, %v2033_v18  ;;  %1563 = vmatpush3.msra.mxu0 %v738_v61  ;;  %1675 = vmatpush3.msra.mxu1 %v929_v58 }
  0xb7   :  { %1540 = vmatprep.mubr.msk.f32.mxu0 %vm115_vm10, %v1736_v22  ;;  %1564 = vmatprep.subr.mxu0 %v737_v62 }
  0xb8   :  { %1541 = vmatmul.mubr.msk.f32.gmra.mxu0 %vm116_vm9, %v1736_v22  ;;  %1307 = vmatmul.mubr.msk.f32.gmra.mxu1 %vm244_vm11, %v1736_v22 }
  0xb9   :  { %1308 = vmatprep.mubr.msk.f32.mxu1 %vm247_vm12, %v1736_v22  ;;  %v102_v51 = vpop.permute.xlu1 %101  ;;  %v99_v52 = vpop.permute.xlu0 %98  ;;  %1565 = vmatpush3.msra.mxu0 %v737_v62  ;;  %v928_v62 = vld [vmem:[%s2399_s6 + $0x68] sm:$0xff] }
  0xba   :  { %vm118_vm13 = vcmp.eq.s32.totalorder %v102_v51, %v2033_v18  ;;  %vm117_vm14 = vcmp.eq.s32.totalorder %v99_v52, %v2033_v18  ;;  %1566 = vmatprep.subr.mxu0 %v736_v63  ;;  %1660 = vmatprep.subr.mxu1 %v928_v62 }
  0xbb   :  { %1543 = vmatprep.mubr.msk.f32.mxu0 %vm117_vm14, %v1736_v22  ;;  %1567 = vmatpush3.msra.mxu0 %v736_v63 }
  0xbc   :  { %1544 = vmatmul.mubr.msk.f32.gmra.mxu0 %vm118_vm13, %v1736_v22  ;;  %1309 = vmatmul.mubr.msk.f32.gmra.mxu1 %vm246_vm15, %v1736_v22 }
  0xbd   :  { %1568 = vmatprep.subr.mxu0 %v735_v0  ;;  %1676 = vmatpush3.msra.mxu1 %v928_v62 }
  0xbe   :  { %1569 = vmatpush3.msra.mxu0 %v735_v0  ;;  %v927_v0 = vld [vmem:[%s2399_s6 + $0x60] sm:$0xff] }
  0xbf   :  { %1570 = vmatprep.subr.mxu0 %v734_v1  ;;  %1661 = vmatprep.subr.mxu1 %v927_v0 }
  0xc0   :  { %1571 = vmatpush3.msra.mxu0 %v734_v1  ;;  %v926_v1 = vld [vmem:[%s2399_s6 + $0x58] sm:$0xff]  ;;  %1677 = vmatpush3.msra.mxu1 %v927_v0 }
  0xc1   :  { %1572 = vmatprep.subr.mxu0 %v733_v2  ;;  %1662 = vmatprep.subr.mxu1 %v926_v1 }
  0xc2   :  { %1573 = vmatpush3.msra.mxu0 %v733_v2  ;;  %v925_v2 = vld [vmem:[%s2399_s6 + $0x50] sm:$0xff]  ;;  %1678 = vmatpush3.msra.mxu1 %v926_v1 }
  0xc3   :  { %1574 = vmatprep.subr.mxu0 %v732_v3  ;;  %1663 = vmatprep.subr.mxu1 %v925_v2 }
  0xc4   :  { %1575 = vmatpush3.msra.mxu0 %v732_v3  ;;  %v924_v3 = vld [vmem:[%s2399_s6 + $0x48] sm:$0xff]  ;;  %1679 = vmatpush3.msra.mxu1 %v925_v2 }
  0xc5   :  { %1576 = vmatprep.subr.mxu0 %v731_v4  ;;  %1664 = vmatprep.subr.mxu1 %v924_v3 }
  0xc6   :  { %1577 = vmatpush3.msra.mxu0 %v731_v4  ;;  %v923_v4 = vld [vmem:[%s2399_s6 + $0x40] sm:$0xff]  ;;  %1680 = vmatpush3.msra.mxu1 %v924_v3 }
  0xc7   :  { %1602 = vmatprep.subr.mxu0 %v930_v56  ;;  %1665 = vmatprep.subr.mxu1 %v923_v4 }
  0xc8   :  { %1681 = vmatpush3.msra.mxu1 %v923_v4 }
 0x140   :  { %v1378_v5 = vpop.f32.mrf.mxu1 }
 0x142   :  { %v1379_v6 = vpop.f32.mrf.mxu1 }
 0x143   :  { %v1380_v9 = vadd.f32 %v1379_v6, %v1378_v5  ;;  %v922_v5 = vld [vmem:[%s2399_s6 + $0x38] sm:$0xff]  ;;  %v921_v6 = vld [vmem:[%s2399_s6 + $0x30] sm:$0xff] }
 0x144   :  { %v1381_v7 = vpop.f32.mrf.mxu1  ;;  %1666 = vmatprep.subr.mxu1 %v922_v5 }
 0x145   :  { %1682 = vmatpush3.msra.mxu1 %v922_v5 }
 0x146   :  { %v1382_v8 = vpop.f32.mrf.mxu1  ;;  %1667 = vmatprep.subr.mxu1 %v921_v6 }
 0x147   :  { %v1383_v10 = vadd.f32 %v1382_v8, %v1381_v7  ;;  %v920_v7 = vld [vmem:[%s2399_s6 + $0x28] sm:$0xff]  ;;  %1683 = vmatpush3.msra.mxu1 %v921_v6  ;;  %v919_v8 = vld [vmem:[%s2399_s6 + $0x20] sm:$0xff] }
 0x148   :  { %v1384_v11 = vpop.f32.mrf.mxu1  ;;  %1668 = vmatprep.subr.mxu1 %v920_v7 }
 0x149   :  { %v1695_v12 = vpack.i.bf16 %v1383_v10, %v1380_v9  ;;  %1684 = vmatpush3.msra.mxu1 %v920_v7 }
 0x14a   :  { %v1385_v13 = vpop.f32.mrf.mxu1  ;;  %1669 = vmatprep.subr.mxu1 %v919_v8 }
 0x14b   :  { %1696 = vrot.lane.b32.xlu0 %v1695_v12, %s1737_s13  ;;  %v1386_v16 = vadd.f32 %v1385_v13, %v1384_v11  ;;  %1685 = vmatpush3.msra.mxu1 %v919_v8 }
 0x14c   :  { %v1387_v14 = vpop.f32.mrf.mxu1 }
 0x14e   :  { %v1388_v15 = vpop.f32.mrf.mxu1 }
 0x14f   :  { %v1389_v17 = vadd.f32 %v1388_v15, %v1387_v14 }
 0x150   :  { %v1390_v18 = vpop.f32.mrf.mxu1 }
 0x151   :  { %v1700_v19 = vpack.i.bf16 %v1389_v17, %v1386_v16 }
 0x152   :  { %v1391_v20 = vpop.f32.mrf.mxu1 }
 0x153   :  { %1701 = vrot.lane.b32.xlu1 %v1700_v19, %s1737_s13  ;;  %v1392_v23 = vadd.f32 %v1391_v20, %v1390_v18 }
 0x154   :  { %v1393_v21 = vpop.f32.mrf.mxu1 }
 0x156   :  { %v1394_v22 = vpop.f32.mrf.mxu1 }
 0x157   :  { %v1395_v24 = vadd.f32 %v1394_v22, %v1393_v21 }
 0x158   :  { %v1396_v25 = vpop.f32.mrf.mxu1 }
 0x159   :  { %v1705_v26 = vpack.i.bf16 %v1395_v24, %v1392_v23 }
 0x15a   :  { %v1397_v27 = vpop.f32.mrf.mxu1 }
 0x15b   :  { %1706 = vrot.lane.b32.xlu0 %v1705_v26, %s1737_s13  ;;  %v1398_v30 = vadd.f32 %v1397_v27, %v1396_v25 }
 0x15c   :  { %v1399_v28 = vpop.f32.mrf.mxu1 }
 0x15e   :  { %v1400_v29 = vpop.f32.mrf.mxu1 }
 0x15f   :  { %v1401_v31 = vadd.f32 %v1400_v29, %v1399_v28 }
 0x160   :  { %v1402_v32 = vpop.f32.mrf.mxu1  ;;  %v1524_v9 = vpop.f32.mrf.mxu0 }
 0x161   :  { %v1710_v33 = vpack.i.bf16 %v1401_v31, %v1398_v30 }
 0x162   :  { %v1403_v34 = vpop.f32.mrf.mxu1  ;;  %v394_v13 = vpop.f32.mrf.mxu0 }
 0x163   :  { %1711 = vrot.lane.b32.xlu1 %v1710_v33, %s1737_s13  ;;  %v1404_v37 = vadd.f32 %v1403_v34, %v1402_v32 }
 0x164   :  { %v1405_v35 = vpop.f32.mrf.mxu1  ;;  %v1527_v16 = vpop.f32.mrf.mxu0 }
 0x166   :  { %v1406_v36 = vpop.f32.mrf.mxu1  ;;  %v404_v20 = vpop.f32.mrf.mxu0 }
 0x167   :  { %v1407_v38 = vadd.f32 %v1406_v36, %v1405_v35 }
 0x168   :  { %v1408_v39 = vpop.f32.mrf.mxu1  ;;  %v1530_v23 = vpop.f32.mrf.mxu0 }
 0x169   :  { %v1715_v40 = vpack.i.bf16 %v1407_v38, %v1404_v37 }
 0x16a   :  { %v1409_v41 = vpop.f32.mrf.mxu1  ;;  %v414_v27 = vpop.f32.mrf.mxu0 }
 0x16b   :  { %1716 = vrot.lane.b32.xlu0 %v1715_v40, %s1737_s13  ;;  %v1410_v44 = vadd.f32 %v1409_v41, %v1408_v39 }
 0x16c   :  { %v1411_v42 = vpop.f32.mrf.mxu1  ;;  %v1533_v30 = vpop.f32.mrf.mxu0 }
 0x16e   :  { %v1412_v43 = vpop.f32.mrf.mxu1  ;;  %v424_v34 = vpop.f32.mrf.mxu0 }
 0x16f   :  { %v1413_v45 = vadd.f32 %v1412_v43, %v1411_v42 }
 0x170   :  { %v1414_v46 = vpop.f32.mrf.mxu1  ;;  %v1536_v37 = vpop.f32.mrf.mxu0 }
 0x171   :  { %v1720_v47 = vpack.i.bf16 %v1413_v45, %v1410_v44 }
 0x172   :  { %v1415_v48 = vpop.f32.mrf.mxu1  ;;  %v434_v41 = vpop.f32.mrf.mxu0 }
 0x173   :  { %1721 = vrot.lane.b32.xlu1 %v1720_v47, %s1737_s13  ;;  %v1416_v51 = vadd.f32 %v1415_v48, %v1414_v46 }
 0x174   :  { %v1417_v49 = vpop.f32.mrf.mxu1  ;;  %v1539_v44 = vpop.f32.mrf.mxu0 }
 0x176   :  { %v1418_v50 = vpop.f32.mrf.mxu1  ;;  %v444_v48 = vpop.f32.mrf.mxu0 }
 0x177   :  { %v1419_v52 = vadd.f32 %v1418_v50, %v1417_v49 }
 0x178   :  { %v1420_v53 = vpop.f32.mrf.mxu1 }
 0x179   :  { %v1725_v54 = vpack.i.bf16 %v1419_v52, %v1416_v51  ;;  %v1542_v51 = vpop.f32.mrf.mxu0 }
 0x17a   :  { %v1421_v55 = vpop.f32.mrf.mxu1 }
 0x17b   :  { %1726 = vrot.lane.b32.xlu0 %v1725_v54, %s1737_s13  ;;  %v1422_v60 = vadd.f32 %v1421_v55, %v1420_v53  ;;  %v454_v55 = vpop.f32.mrf.mxu0 }
 0x17c   :  { %v1423_v57 = vpop.f32.mrf.mxu1 }
 0x17e   :  { %v1424_v59 = vpop.f32.mrf.mxu1 }
 0x17f   :  { %v1425_v61 = vadd.f32 %v1424_v59, %v1423_v57 }
 0x181   :  { %v1730_v63 = vpack.i.bf16 %v1425_v61, %v1422_v60 }
 0x183   :  { %1731 = vrot.lane.b32.xlu1 %v1730_v63, %s1737_s13 }
 0x1bd   :  { %v1697_v10 = vpop.permute.xlu0 %1696 }
 0x1be   :  { %v1699_v11 = vunpack.i.h.bf16 %v1697_v10  ;;  %v1698_v12 = vunpack.i.l.bf16 %v1697_v10 }
 0x1c0   :  { %v715_v14 = vsel %vm714_vm0, %v394_v13, %v1698_v12  ;;  %v716_v15 = vsel %vm714_vm0, %v1524_v9, %v1699_v11 }
 0x1c1   :  { %1578 = vmatprep.mubr.f32.mxu0 %v715_v14 }
 0x1c2   :  { %1579 = vmatmul.mubr.f32.vlgmr.msra.gmra.mxu0 %v716_v15 }
 0x1c3   :  { %1603 = vmatpush3.msra.mxu0 %v930_v56 }
 0x1c4   :  { %1604 = vmatprep.subr.mxu0 %v929_v58 }
 0x1c5   :  { %v1702_v17 = vpop.permute.xlu1 %1701  ;;  %1605 = vmatpush3.msra.mxu0 %v929_v58  ;;  %v1545_v58 = vpop.f32.mrf.mxu0 }
 0x1c6   :  { %v1704_v18 = vunpack.i.h.bf16 %v1702_v17  ;;  %v1703_v19 = vunpack.i.l.bf16 %v1702_v17  ;;  %1606 = vmatprep.subr.mxu0 %v928_v62 }
 0x1c7   :  { %1607 = vmatpush3.msra.mxu0 %v928_v62  ;;  %v464_v62 = vpop.f32.mrf.mxu0 }
 0x1c8   :  { %v717_v21 = vsel %vm714_vm0, %v404_v20, %v1703_v19  ;;  %v718_v22 = vsel %vm714_vm0, %v1527_v16, %v1704_v18  ;;  %1608 = vmatprep.subr.mxu0 %v927_v0 }
 0x1c9   :  { %1581 = vmatprep.mubr.f32.mxu0 %v717_v21  ;;  %1609 = vmatpush3.msra.mxu0 %v927_v0 }
 0x1ca   :  { %1582 = vmatmul.mubr.f32.gmra.mxu0 %v718_v22  ;;  %1610 = vmatprep.subr.mxu0 %v926_v1 }
 0x1cb   :  { %1611 = vmatpush3.msra.mxu0 %v926_v1  ;;  %v918_v1 = vld [vmem:[%s2399_s6 + $0x18] sm:$0xff] }
 0x1cc   :  { %1612 = vmatprep.subr.mxu0 %v925_v2  ;;  %1670 = vmatprep.subr.mxu1 %v918_v1 }
 0x1cd   :  { %v1707_v24 = vpop.permute.xlu0 %1706  ;;  %1613 = vmatpush3.msra.mxu0 %v925_v2  ;;  %v917_v2 = vld [vmem:[%s2399_s6 + $0x10] sm:$0xff]  ;;  %1686 = vmatpush3.msra.mxu1 %v918_v1 }
 0x1ce   :  { %v1709_v25 = vunpack.i.h.bf16 %v1707_v24  ;;  %v1708_v26 = vunpack.i.l.bf16 %v1707_v24  ;;  %1614 = vmatprep.subr.mxu0 %v924_v3  ;;  %1671 = vmatprep.subr.mxu1 %v917_v2 }
 0x1cf   :  { %1615 = vmatpush3.msra.mxu0 %v924_v3  ;;  %v916_v3 = vld [vmem:[%s2399_s6 + $0x8] sm:$0xff]  ;;  %1687 = vmatpush3.msra.mxu1 %v917_v2 }
 0x1d0   :  { %v719_v28 = vsel %vm714_vm0, %v414_v27, %v1708_v26  ;;  %v720_v29 = vsel %vm714_vm0, %v1530_v23, %v1709_v25  ;;  %1616 = vmatprep.subr.mxu0 %v923_v4  ;;  %1672 = vmatprep.subr.mxu1 %v916_v3 }
 0x1d1   :  { %1584 = vmatprep.mubr.f32.mxu0 %v719_v28  ;;  %1617 = vmatpush3.msra.mxu0 %v923_v4  ;;  %v915_v4 = vld [vmem:[%s2399_s6] sm:$0xff] }
 0x1d2   :  { %1585 = vmatmul.mubr.f32.gmra.mxu0 %v720_v29  ;;  %1618 = vmatprep.subr.mxu0 %v922_v5 }
 0x1d3   :  { %1619 = vmatpush3.msra.mxu0 %v922_v5  ;;  %1688 = vmatpush3.msra.mxu1 %v916_v3  ;;  %v1310_v5 = vld [vmem:[%s2400_s5] ss:$0 sm:$0xff] }
 0x1d4   :  { %1620 = vmatprep.subr.mxu0 %v921_v6  ;;  %1673 = vmatprep.subr.mxu1 %v915_v4 }
 0x1d5   :  { %v1712_v31 = vpop.permute.xlu1 %1711  ;;  %1621 = vmatpush3.msra.mxu0 %v921_v6  ;;  %1689 = vmatpush3.msra.mxu1 %v915_v4 }
 0x1d6   :  { %v1714_v32 = vunpack.i.h.bf16 %v1712_v31  ;;  %v1713_v33 = vunpack.i.l.bf16 %v1712_v31  ;;  %1622 = vmatprep.subr.mxu0 %v920_v7 }
 0x1d7   :  { %1623 = vmatpush3.msra.mxu0 %v920_v7 }
 0x1d8   :  { %v721_v35 = vsel %vm714_vm0, %v424_v34, %v1713_v33  ;;  %v722_v36 = vsel %vm714_vm0, %v1533_v30, %v1714_v32  ;;  %1624 = vmatprep.subr.mxu0 %v919_v8 }
 0x1d9   :  { %1587 = vmatprep.mubr.f32.mxu0 %v721_v35  ;;  %1625 = vmatpush3.msra.mxu0 %v919_v8 }
 0x1da   :  { %1588 = vmatmul.mubr.f32.gmra.mxu0 %v722_v36  ;;  %1626 = vmatprep.subr.mxu0 %v918_v1 }
 0x1db   :  { %1627 = vmatpush3.msra.mxu0 %v918_v1 }
 0x1dc   :  { %1628 = vmatprep.subr.mxu0 %v917_v2 }
 0x1dd   :  { %v1717_v38 = vpop.permute.xlu0 %1716  ;;  %1629 = vmatpush3.msra.mxu0 %v917_v2 }
 0x1de   :  { %v1719_v39 = vunpack.i.h.bf16 %v1717_v38  ;;  %v1718_v40 = vunpack.i.l.bf16 %v1717_v38  ;;  %1630 = vmatprep.subr.mxu0 %v916_v3 }
 0x1df   :  { %1631 = vmatpush3.msra.mxu0 %v916_v3 }
 0x1e0   :  { %v723_v42 = vsel %vm714_vm0, %v434_v41, %v1718_v40  ;;  %v724_v43 = vsel %vm714_vm0, %v1536_v37, %v1719_v39  ;;  %1632 = vmatprep.subr.mxu0 %v915_v4 }
 0x1e1   :  { %1590 = vmatprep.mubr.f32.mxu0 %v723_v42  ;;  %1633 = vmatpush3.msra.mxu0 %v915_v4 }
 0x1e2   :  { %1591 = vmatmul.mubr.f32.gmra.mxu0 %v724_v43 }
 0x1e5   :  { %v1722_v45 = vpop.permute.xlu1 %1721 }
 0x1e6   :  { %v1724_v46 = vunpack.i.h.bf16 %v1722_v45  ;;  %v1723_v47 = vunpack.i.l.bf16 %v1722_v45 }
 0x1e8   :  { %v725_v49 = vsel %vm714_vm0, %v444_v48, %v1723_v47  ;;  %v726_v50 = vsel %vm714_vm0, %v1539_v44, %v1724_v46 }
 0x1e9   :  { %1593 = vmatprep.mubr.f32.mxu0 %v725_v49 }
 0x1ea   :  { %1594 = vmatmul.mubr.f32.gmra.mxu0 %v726_v50 }
 0x1ed   :  { %v1727_v52 = vpop.permute.xlu0 %1726 }
 0x1ee   :  { %v1729_v53 = vunpack.i.h.bf16 %v1727_v52  ;;  %v1728_v54 = vunpack.i.l.bf16 %v1727_v52 }
 0x1f0   :  { %v727_v56 = vsel %vm714_vm0, %v454_v55, %v1728_v54  ;;  %v728_v57 = vsel %vm714_vm0, %v1542_v51, %v1729_v53  ;;  %v15_v54 = vstv %s2401_s9  ;;  %v2275_v55 = vld [vmem:[%s2402_s7] ss:$0 sm:$0xff] }
 0x1f1   :  { %1596 = vmatprep.mubr.f32.mxu0 %v727_v56  ;;  %16 = vst [vmem:[#allocation2] sm:$0x1] %v15_v54 }
 0x1f2   :  { %1597 = vmatmul.mubr.f32.gmra.mxu0 %v728_v57 }
 0x1f5   :  { %v1732_v59 = vpop.permute.xlu1 %1731 }
 0x1f6   :  { %v1734_v60 = vunpack.i.h.bf16 %v1732_v59  ;;  %v1733_v61 = vunpack.i.l.bf16 %v1732_v59  ;;  %v2281_v59 = vld [vmem:[%s2403_s8] ss:$0 sm:$0xff] }
 0x1f8   :  { %v729_v63 = vsel %vm714_vm0, %v464_v62, %v1733_v61  ;;  %v730_v0 = vsel %vm714_vm0, %v1545_v58, %v1734_v60 }
 0x1f9   :  { %1599 = vmatprep.mubr.f32.mxu0 %v729_v63 }
 0x1fa   :  { %1600 = vmatmul.mubr.f32.gmra.mxu0 %v730_v0 }
 0x282   :  { %v1580_v6 = vpop.f32.mrf.mxu0 }
 0x283   :  { %v826_v7 = vadd.f32 %v1580_v6, %v1310_v5 }
 0x284   :  { %v820_v8 = vpop.f32.mrf.mxu0 }
 0x285   :  { %v821_v9 = vadd.f32 %v1310_v5, %v820_v8  ;;  %v900_v11 = vmax.f32 %v826_v7, 0.0 }
 0x287   :  { %v899_v10 = vmax.f32 %v821_v9, 0.0 }
 0x289   :  { %1634 = vmatprep.mubr.f32.mxu0 %v899_v10 }
 0x28a   :  { %v1583_v12 = vpop.f32.mrf.mxu0  ;;  %1635 = vmatmul.mubr.f32.vlgmr.msra.gmra.mxu0 %v900_v11 }
 0x28b   :  { %v836_v13 = vadd.f32 %v1583_v12, %v1310_v5 }
 0x28c   :  { %v830_v14 = vpop.f32.mrf.mxu0 }
 0x28d   :  { %v831_v15 = vadd.f32 %v1310_v5, %v830_v14  ;;  %v902_v17 = vmax.f32 %v836_v13, 0.0 }
 0x28f   :  { %v901_v16 = vmax.f32 %v831_v15, 0.0 }
 0x291   :  { %1637 = vmatprep.mubr.f32.mxu0 %v901_v16 }
 0x292   :  { %v1586_v18 = vpop.f32.mrf.mxu0  ;;  %1638 = vmatmul.mubr.f32.gmra.mxu0 %v902_v17 }
 0x293   :  { %v846_v19 = vadd.f32 %v1586_v18, %v1310_v5 }
 0x294   :  { %v840_v20 = vpop.f32.mrf.mxu0 }
 0x295   :  { %v841_v21 = vadd.f32 %v1310_v5, %v840_v20  ;;  %v904_v23 = vmax.f32 %v846_v19, 0.0 }
 0x297   :  { %v903_v22 = vmax.f32 %v841_v21, 0.0 }
 0x299   :  { %1640 = vmatprep.mubr.f32.mxu0 %v903_v22 }
 0x29a   :  { %v1589_v24 = vpop.f32.mrf.mxu0  ;;  %1641 = vmatmul.mubr.f32.gmra.mxu0 %v904_v23 }
 0x29b   :  { %v856_v25 = vadd.f32 %v1589_v24, %v1310_v5 }
 0x29c   :  { %v850_v26 = vpop.f32.mrf.mxu0 }
 0x29d   :  { %v851_v27 = vadd.f32 %v1310_v5, %v850_v26  ;;  %v906_v29 = vmax.f32 %v856_v25, 0.0 }
 0x29f   :  { %v905_v28 = vmax.f32 %v851_v27, 0.0 }
 0x2a1   :  { %1643 = vmatprep.mubr.f32.mxu0 %v905_v28 }
 0x2a2   :  { %v1592_v30 = vpop.f32.mrf.mxu0  ;;  %1644 = vmatmul.mubr.f32.gmra.mxu0 %v906_v29 }
 0x2a3   :  { %v866_v31 = vadd.f32 %v1592_v30, %v1310_v5 }
 0x2a4   :  { %v860_v32 = vpop.f32.mrf.mxu0 }
 0x2a5   :  { %v861_v33 = vadd.f32 %v1310_v5, %v860_v32  ;;  %v908_v35 = vmax.f32 %v866_v31, 0.0 }
 0x2a7   :  { %v907_v34 = vmax.f32 %v861_v33, 0.0 }
 0x2a9   :  { %1646 = vmatprep.mubr.f32.mxu1 %v907_v34 }
 0x2aa   :  { %v1595_v36 = vpop.f32.mrf.mxu0  ;;  %1647 = vmatmul.mubr.f32.vlgmr.msra.gmra.mxu1 %v908_v35 }
 0x2ab   :  { %v876_v37 = vadd.f32 %v1595_v36, %v1310_v5 }
 0x2ac   :  { %v870_v38 = vpop.f32.mrf.mxu0 }
 0x2ad   :  { %v871_v39 = vadd.f32 %v1310_v5, %v870_v38  ;;  %v910_v41 = vmax.f32 %v876_v37, 0.0 }
 0x2af   :  { %v909_v40 = vmax.f32 %v871_v39, 0.0 }
 0x2b1   :  { %1649 = vmatprep.mubr.f32.mxu1 %v909_v40 }
 0x2b2   :  { %v1598_v42 = vpop.f32.mrf.mxu0  ;;  %1650 = vmatmul.mubr.f32.gmra.mxu1 %v910_v41 }
 0x2b3   :  { %v886_v43 = vadd.f32 %v1598_v42, %v1310_v5 }
 0x2b4   :  { %v880_v44 = vpop.f32.mrf.mxu0 }
 0x2b5   :  { %v881_v45 = vadd.f32 %v1310_v5, %v880_v44  ;;  %v912_v47 = vmax.f32 %v886_v43, 0.0 }
 0x2b7   :  { %v911_v46 = vmax.f32 %v881_v45, 0.0 }
 0x2b9   :  { %1652 = vmatprep.mubr.f32.mxu1 %v911_v46 }
 0x2ba   :  { %v1601_v48 = vpop.f32.mrf.mxu0  ;;  %1653 = vmatmul.mubr.f32.gmra.mxu1 %v912_v47 }
 0x2bb   :  { %v896_v49 = vadd.f32 %v1601_v48, %v1310_v5 }
 0x2bc   :  { %v890_v50 = vpop.f32.mrf.mxu0 }
 0x2bd   :  { %v891_v51 = vadd.f32 %v1310_v5, %v890_v50  ;;  %v914_v53 = vmax.f32 %v896_v49, 0.0 }
 0x2bf   :  { %v913_v52 = vmax.f32 %v891_v51, 0.0 }
 0x2c1   :  { %1655 = vmatprep.mubr.f32.mxu1 %v913_v52 }
 0x2c2   :  { %1656 = vmatmul.mubr.f32.gmra.mxu1 %v914_v53 }
 0x34a   :  { %v1636_v56 = vpop.f32.mrf.mxu0 }
 0x34b   :  { %v1010_v57 = vadd.f32 %v1636_v56, %v2275_v55 }
 0x34c   :  { %v1004_v58 = vpop.f32.mrf.mxu0 }
 0x34d   :  { %v1084_v60 = vmax.f32 %v1010_v57, 0.0  ;;  %v1005_v61 = vadd.f32 %v2275_v55, %v1004_v58 }
 0x34f   :  { %v1083_v62 = vmax.f32 %v1005_v61, 0.0  ;;  %v1107_v63 = vmul.f32 %v2281_v59, %v1084_v60 }
 0x351   :  { %v1125_v0 = vsel %vm714_vm0, %v1107_v63, 0.0  ;;  %v1106_v1 = vmul.f32 %v2281_v59, %v1083_v62 }
 0x352   :  { %1126 = vadd.xlane.f32.xlu1 %v1125_v0  ;;  %v1639_v2 = vpop.f32.mrf.mxu0 }
 0x353   :  { %v1020_v3 = vadd.f32 %v1639_v2, %v2275_v55  ;;  %v1122_v4 = vsel %vm714_vm0, %v1106_v1, 0.0 }
 0x354   :  { %v1014_v5 = vpop.f32.mrf.mxu0  ;;  %1123 = vadd.xlane.f32.xlu0 %v1122_v4 }
 0x355   :  { %v1086_v6 = vmax.f32 %v1020_v3, 0.0  ;;  %v1015_v7 = vadd.f32 %v2275_v55, %v1014_v5 }
 0x357   :  { %v1085_v8 = vmax.f32 %v1015_v7, 0.0  ;;  %v1109_v9 = vmul.f32 %v2281_v59, %v1086_v6 }
 0x359   :  { %v1131_v10 = vsel %vm714_vm0, %v1109_v9, 0.0  ;;  %v1108_v11 = vmul.f32 %v2281_v59, %v1085_v8 }
 0x35a   :  { %v1642_v12 = vpop.f32.mrf.mxu0  ;;  %1132 = vadd.xlane.f32.xlu0 %v1131_v10 }
 0x35b   :  { %v1030_v13 = vadd.f32 %v1642_v12, %v2275_v55  ;;  %v1128_v17 = vsel %vm714_vm0, %v1108_v11, 0.0  ;;  %v1313_v11 = vld [vmem:[#allocation2] ss:$0 sm:$0xff] }
 0x35c   :  { %v1024_v14 = vpop.f32.mrf.mxu0 }
 0x35d   :  { %v1088_v15 = vmax.f32 %v1030_v13, 0.0  ;;  %v1025_v16 = vadd.f32 %v2275_v55, %v1024_v14 }
 0x35e   :  { %1129 = vadd.xlane.f32.xlu0 %v1128_v17 }
 0x35f   :  { %v1087_v18 = vmax.f32 %v1025_v16, 0.0  ;;  %v1111_v19 = vmul.f32 %v2281_v59, %v1088_v15 }
 0x361   :  { %v1137_v20 = vsel %vm714_vm0, %v1111_v19, 0.0  ;;  %v1110_v21 = vmul.f32 %v2281_v59, %v1087_v18 }
 0x362   :  { %v1645_v22 = vpop.f32.mrf.mxu0  ;;  %1138 = vadd.xlane.f32.xlu0 %v1137_v20 }
 0x363   :  { %v1040_v23 = vadd.f32 %v1645_v22, %v2275_v55  ;;  %v1134_v24 = vsel %vm714_vm0, %v1110_v21, 0.0 }
 0x364   :  { %v1034_v25 = vpop.f32.mrf.mxu0  ;;  %1135 = vadd.xlane.f32.xlu1 %v1134_v24 }
 0x365   :  { %v1090_v26 = vmax.f32 %v1040_v23, 0.0  ;;  %v1035_v27 = vadd.f32 %v2275_v55, %v1034_v25 }
 0x367   :  { %v1089_v28 = vmax.f32 %v1035_v27, 0.0  ;;  %v1113_v29 = vmul.f32 %v2281_v59, %v1090_v26 }
 0x369   :  { %v1143_v30 = vsel %vm714_vm0, %v1113_v29, 0.0  ;;  %v1112_v31 = vmul.f32 %v2281_v59, %v1089_v28 }
 0x36a   :  { %v1648_v32 = vpop.f32.mrf.mxu1  ;;  %1144 = vadd.xlane.f32.xlu0 %v1143_v30 }
 0x36b   :  { %v1050_v33 = vadd.f32 %v1648_v32, %v2275_v55  ;;  %v1140_v34 = vsel %vm714_vm0, %v1112_v31, 0.0 }
 0x36c   :  { %v1044_v35 = vpop.f32.mrf.mxu1  ;;  %1141 = vadd.xlane.f32.xlu1 %v1140_v34 }
 0x36d   :  { %v1092_v36 = vmax.f32 %v1050_v33, 0.0  ;;  %v1045_v37 = vadd.f32 %v2275_v55, %v1044_v35 }
 0x36f   :  { %v1091_v38 = vmax.f32 %v1045_v37, 0.0  ;;  %v1115_v39 = vmul.f32 %v2281_v59, %v1092_v36 }
 0x371   :  { %v1149_v40 = vsel %vm714_vm0, %v1115_v39, 0.0  ;;  %v1114_v41 = vmul.f32 %v2281_v59, %v1091_v38 }
 0x372   :  { %v1651_v42 = vpop.f32.mrf.mxu1  ;;  %1150 = vadd.xlane.f32.xlu0 %v1149_v40 }
 0x373   :  { %v1060_v43 = vadd.f32 %v1651_v42, %v2275_v55  ;;  %v1146_v44 = vsel %vm714_vm0, %v1114_v41, 0.0 }
 0x374   :  { %v1054_v45 = vpop.f32.mrf.mxu1  ;;  %1147 = vadd.xlane.f32.xlu1 %v1146_v44 }
 0x375   :  { %v1094_v46 = vmax.f32 %v1060_v43, 0.0  ;;  %v1055_v47 = vadd.f32 %v2275_v55, %v1054_v45 }
 0x377   :  { %v1093_v48 = vmax.f32 %v1055_v47, 0.0  ;;  %v1117_v49 = vmul.f32 %v2281_v59, %v1094_v46 }
 0x379   :  { %v1155_v50 = vsel %vm714_vm0, %v1117_v49, 0.0  ;;  %v1116_v51 = vmul.f32 %v2281_v59, %v1093_v48 }
 0x37a   :  { %v1654_v52 = vpop.f32.mrf.mxu1  ;;  %1156 = vadd.xlane.f32.xlu0 %v1155_v50 }
 0x37b   :  { %v1070_v53 = vadd.f32 %v1654_v52, %v2275_v55  ;;  %v1152_v54 = vsel %vm714_vm0, %v1116_v51, 0.0 }
 0x37c   :  { %v1064_v56 = vpop.f32.mrf.mxu1  ;;  %1153 = vadd.xlane.f32.xlu1 %v1152_v54 }
 0x37d   :  { %v1096_v57 = vmax.f32 %v1070_v53, 0.0  ;;  %v1065_v58 = vadd.f32 %v2275_v55, %v1064_v56 }
 0x37f   :  { %v1095_v60 = vmax.f32 %v1065_v58, 0.0  ;;  %v1119_v61 = vmul.f32 %v2281_v59, %v1096_v57 }
 0x381   :  { %v1161_v62 = vsel %vm714_vm0, %v1119_v61, 0.0  ;;  %v1118_v63 = vmul.f32 %v2281_v59, %v1095_v60 }
 0x382   :  { %v1657_v0 = vpop.f32.mrf.mxu1  ;;  %1162 = vadd.xlane.f32.xlu0 %v1161_v62 }
 0x383   :  { %v1080_v1 = vadd.f32 %v1657_v0, %v2275_v55  ;;  %v1158_v2 = vsel %vm714_vm0, %v1118_v63, 0.0 }
 0x384   :  { %v1074_v3 = vpop.f32.mrf.mxu1  ;;  %1159 = vadd.xlane.f32.xlu1 %v1158_v2 }
 0x385   :  { %v1098_v4 = vmax.f32 %v1080_v1, 0.0  ;;  %v1075_v5 = vadd.f32 %v2275_v55, %v1074_v3 }
 0x387   :  { %v1097_v6 = vmax.f32 %v1075_v5, 0.0  ;;  %v1121_v7 = vmul.f32 %v2281_v59, %v1098_v4 }
 0x389   :  { %v1167_v8 = vsel %vm714_vm0, %v1121_v7, 0.0  ;;  %v1120_v9 = vmul.f32 %v2281_v59, %v1097_v6 }
 0x38a   :  { %1168 = vadd.xlane.f32.xlu0 %v1167_v8 }
 0x38b   :  { %v1164_v10 = vsel %vm714_vm0, %v1120_v9, 0.0 }
 0x38c   :  { %1165 = vadd.xlane.f32.xlu1 %v1164_v10 }
 0x3db   :  { %v1127_v12 = vpop.xlane.xlu1 %1126 }
 0x3dc   :  { %v1178_v13 = vadd.f32 %v1313_v11, %v1127_v12 }
 0x3dd   :  { %v1124_v14 = vpop.xlane.xlu0 %1123 }
 0x3de   :  { %1195 = vst.msk [vmem:[%s2404_s10 + $0x8] sm:$0xff] %vm1193_vm1, %v1178_v13  ;;  %v1177_v55 = vadd.f32 %v1313_v11, %v1124_v14 }
 0x3e0   :  { %1194 = vst.msk [vmem:[%s2404_s10] sm:$0xff] %vm1193_vm1, %v1177_v55 }
 0x3e3   :  { %v1133_v59 = vpop.xlane.xlu0 %1132 }
 0x3e4   :  { %v1180_v15 = vadd.f32 %v1313_v11, %v1133_v59 }
 0x3e6   :  { %1197 = vst.msk [vmem:[%s2404_s10 + $0x18] sm:$0xff] %vm1193_vm1, %v1180_v15 }
 0x3e7   :  { %v1130_v16 = vpop.xlane.xlu0 %1129 }
 0x3e8   :  { %v1179_v17 = vadd.f32 %v1313_v11, %v1130_v16 }
 0x3ea   :  { %1196 = vst.msk [vmem:[%s2404_s10 + $0x10] sm:$0xff] %vm1193_vm1, %v1179_v17 }
 0x3eb   :  { %v1139_v18 = vpop.xlane.xlu0 %1138 }
 0x3ec   :  { %v1182_v19 = vadd.f32 %v1313_v11, %v1139_v18 }
 0x3ed   :  { %v1136_v20 = vpop.xlane.xlu1 %1135 }
 0x3ee   :  { %1199 = vst.msk [vmem:[%s2404_s10 + $0x28] sm:$0xff] %vm1193_vm1, %v1182_v19  ;;  %v1181_v21 = vadd.f32 %v1313_v11, %v1136_v20 }
 0x3f0   :  { %1198 = vst.msk [vmem:[%s2404_s10 + $0x20] sm:$0xff] %vm1193_vm1, %v1181_v21 }
 0x3f3   :  { %v1145_v22 = vpop.xlane.xlu0 %1144 }
 0x3f4   :  { %v1184_v23 = vadd.f32 %v1313_v11, %v1145_v22 }
 0x3f5   :  { %v1142_v24 = vpop.xlane.xlu1 %1141 }
 0x3f6   :  { %1201 = vst.msk [vmem:[%s2404_s10 + $0x38] sm:$0xff] %vm1193_vm1, %v1184_v23  ;;  %v1183_v25 = vadd.f32 %v1313_v11, %v1142_v24 }
 0x3f8   :  { %1200 = vst.msk [vmem:[%s2404_s10 + $0x30] sm:$0xff] %vm1193_vm1, %v1183_v25 }
 0x3fb   :  { %v1151_v26 = vpop.xlane.xlu0 %1150 }
 0x3fc   :  { %v1186_v27 = vadd.f32 %v1313_v11, %v1151_v26 }
 0x3fd   :  { %v1148_v28 = vpop.xlane.xlu1 %1147 }
 0x3fe   :  { %1203 = vst.msk [vmem:[%s2404_s10 + $0x48] sm:$0xff] %vm1193_vm1, %v1186_v27  ;;  %v1185_v29 = vadd.f32 %v1313_v11, %v1148_v28 }
 0x400   :  { %1202 = vst.msk [vmem:[%s2404_s10 + $0x40] sm:$0xff] %vm1193_vm1, %v1185_v29 }
 0x403   :  { %v1157_v30 = vpop.xlane.xlu0 %1156 }
 0x404   :  { %v1188_v31 = vadd.f32 %v1313_v11, %v1157_v30 }
 0x405   :  { %v1154_v32 = vpop.xlane.xlu1 %1153 }
 0x406   :  { %1205 = vst.msk [vmem:[%s2404_s10 + $0x58] sm:$0xff] %vm1193_vm1, %v1188_v31  ;;  %v1187_v33 = vadd.f32 %v1313_v11, %v1154_v32 }
 0x408   :  { %1204 = vst.msk [vmem:[%s2404_s10 + $0x50] sm:$0xff] %vm1193_vm1, %v1187_v33 }
 0x40b   :  { %v1163_v34 = vpop.xlane.xlu0 %1162 }
 0x40c   :  { %v1190_v35 = vadd.f32 %v1313_v11, %v1163_v34 }
 0x40d   :  { %v1160_v36 = vpop.xlane.xlu1 %1159 }
 0x40e   :  { %1207 = vst.msk [vmem:[%s2404_s10 + $0x68] sm:$0xff] %vm1193_vm1, %v1190_v35  ;;  %v1189_v37 = vadd.f32 %v1313_v11, %v1160_v36 }
 0x410   :  { %1206 = vst.msk [vmem:[%s2404_s10 + $0x60] sm:$0xff] %vm1193_vm1, %v1189_v37 }
 0x413   :  { %v1169_v38 = vpop.xlane.xlu0 %1168 }
 0x414   :  { %v1192_v39 = vadd.f32 %v1313_v11, %v1169_v38 }
 0x415   :  { %v1166_v40 = vpop.xlane.xlu1 %1165 }
 0x416   :  { %1209 = vst.msk [vmem:[%s2404_s10 + $0x78] sm:$0xff] %vm1193_vm1, %v1192_v39  ;;  %v1191_v41 = vadd.f32 %v1313_v11, %v1166_v40 }
 0x418   :  { %1208 = vst.msk [vmem:[%s2404_s10 + $0x70] sm:$0xff] %vm1193_vm1, %v1191_v41 }

</bundles_post_ra>
